<compile_context>
chip_gen: v7x
topology: tpu7x:2x2x1
jax: 0.10.0
libtpu: 0.0.40
codegen_flags: <defaults>
</compile_context>

<pallas_src>
import jax
import jax.numpy as jnp
from jax import lax
from jax.experimental import pallas as pl
from jax.experimental.pallas import tpu as pltpu


def gat_kernel(x_ref, adj_ref, w_ref, e_ref, g1_ref, g2_ref, g2b_ref, out_ref):
    Bt, N, F = x_ref.shape
    HF = w_ref.shape[1]
    H = HF // F

    x3 = x_ref[...]                                   # (Bt, N, F)
    adj = adj_ref[...]                                # (Bt, N, N)

    # --- fused per-head projections: ONE matmul each for h and hE -----------
    xf = x3.reshape(Bt * N, F)                        # leading-dim reshape (free)
    h_all = jnp.dot(xf, w_ref[...],
                    preferred_element_type=jnp.float32)      # (Bt*N, H*F) = [h0 | h1]
    hE_all = jnp.dot(h_all, e_ref[...],
                     preferred_element_type=jnp.float32)     # (Bt*N, H*F) = [h0E0 | h1E1]
    h_all = h_all.reshape(Bt, N, HF)
    hE_all = hE_all.reshape(Bt, N, HF)

    mask = adj > 0
    neg_big = jnp.float32(-1e25)

    acc = jnp.zeros((Bt, N, F), jnp.float32)
    for hd in range(H):                               # H is tiny & static -> unrolled
        sl = slice(hd * F, (hd + 1) * F)
        h_hd = h_all[:, :, sl]                        # (Bt, N, F)
        hE_hd = hE_all[:, :, sl]                      # (Bt, N, F)

        # e_sym[b,j,k] = hE[b,j].h[b,k] + h[b,j].hE[b,k]  (== e + e.T) computed
        # with two transpose-free batched matmuls (no XLU vxpose, no extra pass).
        dn = (((2,), (2,)), ((0,), (0,)))
        e_sym = (lax.dot_general(hE_hd, h_hd, dimension_numbers=dn,
                                 preferred_element_type=jnp.float32)
                 + lax.dot_general(h_hd, hE_hd, dimension_numbers=dn,
                                   preferred_element_type=jnp.float32))   # (Bt, N, N)

        att = jnp.where(mask, e_sym, neg_big)
        # torch F.softmax(dim=2) == softmax over the j (row) axis of (j, k).
        att = att - jnp.max(att, axis=1, keepdims=True)
        att = jnp.exp(att)
        denom = jnp.sum(att, axis=1, keepdims=True)
        att = att * pl.reciprocal(denom, approx=True)          # EUP, not a VALU divide

        acc = acc + lax.dot_general(
            att * adj, h_hd,
            dimension_numbers=(((2,), (1,)), ((0,), (0,))),
            preferred_element_type=jnp.float32)                # (Bt, N, F)

    h_mean = jnp.maximum(acc * jnp.float32(1.0 / H), 0.0)       # mean over heads + relu

    # --- gating: VPU multiply + lane reduction (no 1-column MXU matmuls) -----
    g1 = g1_ref[...]                                  # (1, F)
    g2 = g2_ref[...]                                  # (1, F)
    b2 = g2b_ref[0, 0]                                # scalar from SMEM
    logit = jnp.sum(x3 * g1 + h_mean * g2, axis=-1, keepdims=True) + b2   # (Bt, N, 1)
    coeff = pl.reciprocal(1.0 + jnp.exp(-logit), approx=True)             # sigmoid
    out_ref[...] = coeff * x3 + (1.0 - coeff) * h_mean


def gat_forward(x, adj, W, E, g1_w, g2_w, g2_b, *, batch_tile=8):
    B, N, F = x.shape
    H = W.shape[0]

    # Batch tile: as many graphs per grid step as requested / divisible.
    Bt = max(1, min(batch_tile, B))
    while B % Bt:
        Bt -= 1

    # Stack heads so both heads share one matmul:
    #   x @ [W0 | W1] = [h0 | h1],   [h0 | h1] @ blockdiag(E0, E1) = [h0E0 | h1E1]
    W_stacked = jnp.concatenate([W[h] for h in range(H)], axis=1)        # (F, H*F)
    E_blk = jnp.zeros((H * F, H * F), E.dtype)
    for h in range(H):
        E_blk = E_blk.at[h * F:(h + 1) * F, h * F:(h + 1) * F].set(E[h])

    g2_b = g2_b.reshape(1, 1)

    return pl.pallas_call(
        gat_kernel,
        out_shape=jax.ShapeDtypeStruct((B, N, F), jnp.float32),
        grid_spec=pltpu.PrefetchScalarGridSpec(
            num_scalar_prefetch=0,
            grid=(B // Bt,),
            in_specs=[
                pl.BlockSpec((Bt, N, F), lambda b: (b, 0, 0)),      # x
                pl.BlockSpec((Bt, N, N), lambda b: (b, 0, 0)),      # adj
                pl.BlockSpec((F, H * F), lambda b: (0, 0)),         # W (head-stacked)
                pl.BlockSpec((H * F, H * F), lambda b: (0, 0)),     # E (block-diag)
                pl.BlockSpec((1, F), lambda b: (0, 0)),             # gate1 weight
                pl.BlockSpec((1, F), lambda b: (0, 0)),             # gate2 weight
                pl.BlockSpec(memory_space=pltpu.MemorySpace.SMEM),  # gate2 bias (scalar)
            ],
            # NOTE(v5e): if F stays < 128 lanes, the out block could be flattened
            # to (Bt, N*F) for unmasked full-lane stores; skipped at these shapes.
            out_specs=pl.BlockSpec((Bt, N, F), lambda b: (b, 0, 0)),
        ),
        compiler_params=pltpu.CompilerParams(
            dimension_semantics=("parallel",),
            vmem_limit_bytes=32 * 1024 * 1024),
    )(x, adj, W_stacked, E_blk, g1_w, g2_w, g2_b)


def gat_reference(x, adj, W, E, g1_w, g2_w, g2_b):
    """Pure-JAX reference mirroring the PyTorch multi-head branch."""
    h = jnp.einsum('bnf,hfg->hbng', x, W)
    hE = jnp.einsum('hbnf,hfg->hbng', h, E)
    e = jnp.einsum('hbjl,hbkl->hbjk', hE, h)
    e = e + jnp.swapaxes(e, -1, -2)
    att = jnp.where(adj[None] > 0, e, jnp.float32(-1e25))
    att = jax.nn.softmax(att, axis=2)
    ah = jnp.einsum('hbij,hbjk->hbik', att * adj[None], h)
    h_mean = jax.nn.relu(jnp.mean(ah, axis=0))
    logit = x @ g1_w.T + h_mean @ g2_w.T + g2_b
    coeff = jax.nn.sigmoid(logit)
    return coeff * x + (1.0 - coeff) * h_mean


if __name__ == "__main__":
    B, N, F, H = 16, 8, 32, 2   # batch, nodes, features, heads
    key = jax.random.PRNGKey(0)
    kx, ka, kw, ke, kg1, kg2, kb = jax.random.split(key, 7)

    x = jax.random.normal(kx, (B, N, F), dtype=jnp.float32)
    # symmetric 0/1 adjacency with self loops (guarantees no empty softmax column)
    a = (jax.random.uniform(ka, (B, N, N)) > 0.5).astype(jnp.float32)
    adj = jnp.clip(a + jnp.swapaxes(a, -1, -2) + jnp.eye(N)[None], 0.0, 1.0)

    # Deterministic synthetic parameters (module __init__ uses zeros; random
    # values are used here to exercise the compute path).
    W = 0.1 * jax.random.normal(kw, (H, F, F), dtype=jnp.float32)
    E = 0.1 * jax.random.normal(ke, (H, F, F), dtype=jnp.float32)
    g1_w = 0.1 * jax.random.normal(kg1, (1, F), dtype=jnp.float32)
    g2_w = 0.1 * jax.random.normal(kg2, (1, F), dtype=jnp.float32)
    g2_b = 0.1 * jax.random.normal(kb, (1, 1), dtype=jnp.float32)

    out = gat_forward(x, adj, W, E, g1_w, g2_w, g2_b, batch_tile=8)
    out = jax.block_until_ready(out)

    ref = gat_reference(x, adj, W, E, g1_w, g2_w, g2_b)
    assert out.shape == (B, N, F)
    max_err = float(jnp.max(jnp.abs(out - ref)))
    # Slightly looser tolerance than exact f32: the softmax denominator and the
    # sigmoid use the approximate EUP reciprocal per the perf review.
    assert jnp.allclose(out, ref, atol=5e-3, rtol=5e-3), (
        f"mismatch vs reference (max abs err {max_err})")

    print("KERNEL_OK")
</pallas_src>

<mosaic_0001>
module attributes {stable_mosaic.version = 11 : i64} {
  func.func @gat_kernel(%arg0: i32, %arg1: memref<8x8x32xf32, #tpu.memory_space<vmem>>, %arg2: memref<8x8x8xf32, #tpu.memory_space<vmem>>, %arg3: memref<32x64xf32, #tpu.memory_space<vmem>>, %arg4: memref<64x64xf32, #tpu.memory_space<vmem>>, %arg5: memref<1x32xf32, #tpu.memory_space<vmem>>, %arg6: memref<1x32xf32, #tpu.memory_space<vmem>>, %arg7: memref<1x1xf32, #tpu.memory_space<smem>>, %arg8: memref<8x8x32xf32, #tpu.memory_space<vmem>>) attributes {dimension_semantics = [#tpu.dimension_semantics<parallel>], iteration_bounds = array<i64: 2>, scalar_prefetch = 0 : i64, scratch_operands = 0 : i64, tpu.core_type = #tpu.core_type<tc>, window_params = [{transform_indices = @transform_0, window_bounds = array<i64: 8, 8, 32>}, {transform_indices = @transform_1, window_bounds = array<i64: 8, 8, 8>}, {pipeline_mode = #tpu.pipeline_mode<synchronous>, transform_indices = @transform_2, window_bounds = array<i64: 32, 64>}, {pipeline_mode = #tpu.pipeline_mode<synchronous>, transform_indices = @transform_3, window_bounds = array<i64: 64, 64>}, {pipeline_mode = #tpu.pipeline_mode<synchronous>, transform_indices = @transform_4, window_bounds = array<i64: 1, 32>}, {pipeline_mode = #tpu.pipeline_mode<synchronous>, transform_indices = @transform_5, window_bounds = array<i64: 1, 32>}, {transform_indices = @transform_6, window_bounds = array<i64: 1, 1>}, {transform_indices = @transform_7, window_bounds = array<i64: 8, 8, 32>}]} {
    %c0 = arith.constant 0 : index
    %c0_0 = arith.constant 0 : index
    %c0_1 = arith.constant 0 : index
    %0 = vector.load %arg1[%c0, %c0_0, %c0_1] : memref<8x8x32xf32, #tpu.memory_space<vmem>>, vector<8x8x32xf32>
    %c0_2 = arith.constant 0 : index
    %c0_3 = arith.constant 0 : index
    %c0_4 = arith.constant 0 : index
    %1 = vector.load %arg2[%c0_2, %c0_3, %c0_4] : memref<8x8x8xf32, #tpu.memory_space<vmem>>, vector<8x8x8xf32>
    %2 = vector.shape_cast %0 : vector<8x8x32xf32> to vector<64x32xf32>
    %c0_5 = arith.constant 0 : index
    %c0_6 = arith.constant 0 : index
    %3 = vector.load %arg3[%c0_5, %c0_6] : memref<32x64xf32, #tpu.memory_space<vmem>>, vector<32x64xf32>
    %cst = arith.constant dense<0.000000e+00> : vector<64x64xf32>
    %4 = tpu.matmul %2, %3, %cst {dimension_numbers = #tpu.dot_dimension_numbers<[1], [0], [0], [1], [0, 0, 1, 1], [], []>} : vector<64x32xf32>, vector<32x64xf32>, vector<64x64xf32> -> vector<64x64xf32>
    %c0_7 = arith.constant 0 : index
    %c0_8 = arith.constant 0 : index
    %5 = vector.load %arg4[%c0_7, %c0_8] : memref<64x64xf32, #tpu.memory_space<vmem>>, vector<64x64xf32>
    %cst_9 = arith.constant dense<0.000000e+00> : vector<64x64xf32>
    %6 = tpu.matmul %4, %5, %cst_9 {dimension_numbers = #tpu.dot_dimension_numbers<[1], [0], [0], [1], [0, 0, 1, 1], [], []>} : vector<64x64xf32>, vector<64x64xf32>, vector<64x64xf32> -> vector<64x64xf32>
    %7 = vector.shape_cast %4 : vector<64x64xf32> to vector<8x8x64xf32>
    %8 = vector.shape_cast %6 : vector<64x64xf32> to vector<8x8x64xf32>
    %cst_10 = arith.constant 0.000000e+00 : f32
    %9 = vector.broadcast %cst_10 : f32 to vector<8x8x8xf32>
    %10 = arith.cmpf ogt, %1, %9 : vector<8x8x8xf32>
    %cst_11 = arith.constant 0.000000e+00 : f32
    %11 = vector.broadcast %cst_11 : f32 to vector<8x8x32xf32>
    %12 = vector.extract_strided_slice %7 {offsets = [0, 0, 0], sizes = [8, 8, 32], strides = [1, 1, 1]} : vector<8x8x64xf32> to vector<8x8x32xf32>
    %13 = vector.extract_strided_slice %8 {offsets = [0, 0, 0], sizes = [8, 8, 32], strides = [1, 1, 1]} : vector<8x8x64xf32> to vector<8x8x32xf32>
    %cst_12 = arith.constant dense<0.000000e+00> : vector<8x8x8xf32>
    %14 = tpu.matmul %13, %12, %cst_12 {dimension_numbers = #tpu.dot_dimension_numbers<[2], [2], [1], [1], [0, 0, 0, 1, 1, 1], [0], [0]>} : vector<8x8x32xf32>, vector<8x8x32xf32>, vector<8x8x8xf32> -> vector<8x8x8xf32>
    %cst_13 = arith.constant dense<0.000000e+00> : vector<8x8x8xf32>
    %15 = tpu.matmul %12, %13, %cst_13 {dimension_numbers = #tpu.dot_dimension_numbers<[2], [2], [1], [1], [0, 0, 0, 1, 1, 1], [0], [0]>} : vector<8x8x32xf32>, vector<8x8x32xf32>, vector<8x8x8xf32> -> vector<8x8x8xf32>
    %16 = arith.addf %14, %15 : vector<8x8x8xf32>
    %cst_14 = arith.constant -9.99999956E+24 : f32
    %17 = vector.broadcast %cst_14 : f32 to vector<8x8x8xf32>
    %18 = arith.select %10, %16, %17 : vector<8x8x8xi1>, vector<8x8x8xf32>
    %cst_15 = arith.constant dense<0xFF800000> : vector<8x8xf32>
    %19 = vector.multi_reduction <maximumf>, %18, %cst_15 [1] : vector<8x8x8xf32> to vector<8x8xf32>
    %20 = vector.shape_cast %19 : vector<8x8xf32> to vector<8x1x8xf32>
    %21 = vector.broadcast %20 : vector<8x1x8xf32> to vector<8x8x8xf32>
    %22 = arith.subf %18, %21 : vector<8x8x8xf32>
    %23 = math.exp %22 : vector<8x8x8xf32>
    %cst_16 = arith.constant dense<0.000000e+00> : vector<8x8xf32>
    %24 = vector.multi_reduction <add>, %23, %cst_16 [1] : vector<8x8x8xf32> to vector<8x8xf32>
    %25 = vector.shape_cast %24 : vector<8x8xf32> to vector<8x1x8xf32>
    %26 = tpu.reciprocal %25 {approx = true} : vector<8x1x8xf32> -> vector<8x1x8xf32>
    %27 = vector.broadcast %26 : vector<8x1x8xf32> to vector<8x8x8xf32>
    %28 = arith.mulf %23, %27 : vector<8x8x8xf32>
    %29 = arith.mulf %28, %1 : vector<8x8x8xf32>
    %cst_17 = arith.constant dense<0.000000e+00> : vector<8x8x32xf32>
    %30 = tpu.matmul %29, %12, %cst_17 {dimension_numbers = #tpu.dot_dimension_numbers<[2], [1], [1], [2], [0, 0, 0, 1, 1, 2], [0], [0]>} : vector<8x8x8xf32>, vector<8x8x32xf32>, vector<8x8x32xf32> -> vector<8x8x32xf32>
    %31 = arith.addf %11, %30 : vector<8x8x32xf32>
    %32 = vector.extract_strided_slice %7 {offsets = [0, 0, 32], sizes = [8, 8, 32], strides = [1, 1, 1]} : vector<8x8x64xf32> to vector<8x8x32xf32>
    %33 = vector.extract_strided_slice %8 {offsets = [0, 0, 32], sizes = [8, 8, 32], strides = [1, 1, 1]} : vector<8x8x64xf32> to vector<8x8x32xf32>
    %cst_18 = arith.constant dense<0.000000e+00> : vector<8x8x8xf32>
    %34 = tpu.matmul %33, %32, %cst_18 {dimension_numbers = #tpu.dot_dimension_numbers<[2], [2], [1], [1], [0, 0, 0, 1, 1, 1], [0], [0]>} : vector<8x8x32xf32>, vector<8x8x32xf32>, vector<8x8x8xf32> -> vector<8x8x8xf32>
    %cst_19 = arith.constant dense<0.000000e+00> : vector<8x8x8xf32>
    %35 = tpu.matmul %32, %33, %cst_19 {dimension_numbers = #tpu.dot_dimension_numbers<[2], [2], [1], [1], [0, 0, 0, 1, 1, 1], [0], [0]>} : vector<8x8x32xf32>, vector<8x8x32xf32>, vector<8x8x8xf32> -> vector<8x8x8xf32>
    %36 = arith.addf %34, %35 : vector<8x8x8xf32>
    %cst_20 = arith.constant -9.99999956E+24 : f32
    %37 = vector.broadcast %cst_20 : f32 to vector<8x8x8xf32>
    %38 = arith.select %10, %36, %37 : vector<8x8x8xi1>, vector<8x8x8xf32>
    %cst_21 = arith.constant dense<0xFF800000> : vector<8x8xf32>
    %39 = vector.multi_reduction <maximumf>, %38, %cst_21 [1] : vector<8x8x8xf32> to vector<8x8xf32>
    %40 = vector.shape_cast %39 : vector<8x8xf32> to vector<8x1x8xf32>
    %41 = vector.broadcast %40 : vector<8x1x8xf32> to vector<8x8x8xf32>
    %42 = arith.subf %38, %41 : vector<8x8x8xf32>
    %43 = math.exp %42 : vector<8x8x8xf32>
    %cst_22 = arith.constant dense<0.000000e+00> : vector<8x8xf32>
    %44 = vector.multi_reduction <add>, %43, %cst_22 [1] : vector<8x8x8xf32> to vector<8x8xf32>
    %45 = vector.shape_cast %44 : vector<8x8xf32> to vector<8x1x8xf32>
    %46 = tpu.reciprocal %45 {approx = true} : vector<8x1x8xf32> -> vector<8x1x8xf32>
    %47 = vector.broadcast %46 : vector<8x1x8xf32> to vector<8x8x8xf32>
    %48 = arith.mulf %43, %47 : vector<8x8x8xf32>
    %49 = arith.mulf %48, %1 : vector<8x8x8xf32>
    %cst_23 = arith.constant dense<0.000000e+00> : vector<8x8x32xf32>
    %50 = tpu.matmul %49, %32, %cst_23 {dimension_numbers = #tpu.dot_dimension_numbers<[2], [1], [1], [2], [0, 0, 0, 1, 1, 2], [0], [0]>} : vector<8x8x8xf32>, vector<8x8x32xf32>, vector<8x8x32xf32> -> vector<8x8x32xf32>
    %51 = arith.addf %31, %50 : vector<8x8x32xf32>
    %cst_24 = arith.constant 5.000000e-01 : f32
    %52 = vector.broadcast %cst_24 : f32 to vector<8x8x32xf32>
    %53 = arith.mulf %51, %52 : vector<8x8x32xf32>
    %cst_25 = arith.constant 0.000000e+00 : f32
    %54 = vector.broadcast %cst_25 : f32 to vector<8x8x32xf32>
    %55 = arith.maximumf %53, %54 : vector<8x8x32xf32>
    %c0_26 = arith.constant 0 : index
    %c0_27 = arith.constant 0 : index
    %56 = vector.load %arg5[%c0_26, %c0_27] : memref<1x32xf32, #tpu.memory_space<vmem>>, vector<1x32xf32>
    %c0_28 = arith.constant 0 : index
    %c0_29 = arith.constant 0 : index
    %57 = vector.load %arg6[%c0_28, %c0_29] : memref<1x32xf32, #tpu.memory_space<vmem>>, vector<1x32xf32>
    %c0_30 = arith.constant 0 : index
    %c0_31 = arith.constant 0 : index
    %58 = memref.load %arg7[%c0_30, %c0_31] : memref<1x1xf32, #tpu.memory_space<smem>>
    %59 = vector.shape_cast %56 : vector<1x32xf32> to vector<1x1x32xf32>
    %60 = vector.broadcast %59 : vector<1x1x32xf32> to vector<8x8x32xf32>
    %61 = arith.mulf %0, %60 : vector<8x8x32xf32>
    %62 = vector.shape_cast %57 : vector<1x32xf32> to vector<1x1x32xf32>
    %63 = vector.broadcast %62 : vector<1x1x32xf32> to vector<8x8x32xf32>
    %64 = arith.mulf %55, %63 : vector<8x8x32xf32>
    %65 = arith.addf %61, %64 : vector<8x8x32xf32>
    %cst_32 = arith.constant dense<0.000000e+00> : vector<8x8xf32>
    %66 = vector.multi_reduction <add>, %65, %cst_32 [2] : vector<8x8x32xf32> to vector<8x8xf32>
    %67 = vector.shape_cast %66 : vector<8x8xf32> to vector<8x8x1xf32>
    %68 = vector.broadcast %58 : f32 to vector<8x8x1xf32>
    %69 = arith.addf %67, %68 : vector<8x8x1xf32>
    %cst_33 = arith.constant 0.000000e+00 : f32
    %70 = vector.broadcast %cst_33 : f32 to vector<8x8x1xf32>
    %71 = arith.subf %70, %69 : vector<8x8x1xf32>
    %72 = math.exp %71 : vector<8x8x1xf32>
    %cst_34 = arith.constant 1.000000e+00 : f32
    %73 = vector.broadcast %cst_34 : f32 to vector<8x8x1xf32>
    %74 = arith.addf %73, %72 : vector<8x8x1xf32>
    %75 = tpu.reciprocal %74 {approx = true} : vector<8x8x1xf32> -> vector<8x8x1xf32>
    %76 = vector.broadcast %75 : vector<8x8x1xf32> to vector<8x8x32xf32>
    %77 = arith.mulf %76, %0 : vector<8x8x32xf32>
    %cst_35 = arith.constant 1.000000e+00 : f32
    %78 = vector.broadcast %cst_35 : f32 to vector<8x8x1xf32>
    %79 = arith.subf %78, %75 : vector<8x8x1xf32>
    %80 = vector.broadcast %79 : vector<8x8x1xf32> to vector<8x8x32xf32>
    %81 = arith.mulf %80, %55 : vector<8x8x32xf32>
    %82 = arith.addf %77, %81 : vector<8x8x32xf32>
    %c0_36 = arith.constant 0 : index
    %c0_37 = arith.constant 0 : index
    %c0_38 = arith.constant 0 : index
    %83 = vector.load %arg8[%c0_36, %c0_37, %c0_38] : memref<8x8x32xf32, #tpu.memory_space<vmem>>, vector<8x8x32xf32>
    tpu.vector_store %arg8[%c0_36, %c0_37, %c0_38], %82 {strides = array<i32>} : memref<8x8x32xf32, #tpu.memory_space<vmem>>, vector<8x8x32xf32>,
    return
  }
  func.func @transform_0(%arg0: i32) -> (i32, i32, i32) {
    %c0_i32 = arith.constant 0 : i32
    %c0_i32_0 = arith.constant 0 : i32
    %c0_i32_1 = arith.constant 0 : i32
    return %arg0, %c0_i32, %c0_i32_0 : i32, i32, i32
  }
  func.func @transform_1(%arg0: i32) -> (i32, i32, i32) {
    %c0_i32 = arith.constant 0 : i32
    %c0_i32_0 = arith.constant 0 : i32
    %c0_i32_1 = arith.constant 0 : i32
    return %arg0, %c0_i32, %c0_i32_0 : i32, i32, i32
  }
  func.func @transform_2(%arg0: i32) -> (i32, i32) {
    %c0_i32 = arith.constant 0 : i32
    %c0_i32_0 = arith.constant 0 : i32
    %c0_i32_1 = arith.constant 0 : i32
    return %c0_i32, %c0_i32_0 : i32, i32
  }
  func.func @transform_3(%arg0: i32) -> (i32, i32) {
    %c0_i32 = arith.constant 0 : i32
    %c0_i32_0 = arith.constant 0 : i32
    %c0_i32_1 = arith.constant 0 : i32
    return %c0_i32, %c0_i32_0 : i32, i32
  }
  func.func @transform_4(%arg0: i32) -> (i32, i32) {
    %c0_i32 = arith.constant 0 : i32
    %c0_i32_0 = arith.constant 0 : i32
    %c0_i32_1 = arith.constant 0 : i32
    return %c0_i32, %c0_i32_0 : i32, i32
  }
  func.func @transform_5(%arg0: i32) -> (i32, i32) {
    %c0_i32 = arith.constant 0 : i32
    %c0_i32_0 = arith.constant 0 : i32
    %c0_i32_1 = arith.constant 0 : i32
    return %c0_i32, %c0_i32_0 : i32, i32
  }
  func.func @transform_6(%arg0: i32) -> (i32, i32) {
    %c0_i32 = arith.constant 0 : i32
    %c0_i32_0 = arith.constant 0 : i32
    %c0_i32_1 = arith.constant 0 : i32
    return %c0_i32, %c0_i32_0 : i32, i32
  }
  func.func @transform_7(%arg0: i32) -> (i32, i32, i32) {
    %c0_i32 = arith.constant 0 : i32
    %c0_i32_0 = arith.constant 0 : i32
    %c0_i32_1 = arith.constant 0 : i32
    return %arg0, %c0_i32, %c0_i32_0 : i32, i32, i32
  }
}

</mosaic_0001>

<bundles_post_ra>
// kernel: tpu_custom_call.1
= control target key start
LH: loop header
LB: loop body
LE: loop exit
PB: predicated region body
PF: predicated region fallthrough
CT: control target
= control target key end

     0   :  { %s6595_s0 = inlined_call_operand.vmem [shape: f32[16,8,32], index: 0, kind: input, shape index: {}]   ;;  %s6596_s1 = inlined_call_operand.vmem [shape: f32[16,8,8], index: 1, kind: input, shape index: {}]   ;;  %s6597_s2 = inlined_call_operand.hbm [shape: f32[32,64], index: 2, kind: input, shape index: {}]   ;;  %s6598_s3 = inlined_call_operand.vmem [shape: f32[64,64], index: 3, kind: input, shape index: {}]   ;;  %s6599_s4 = inlined_call_operand.vmem [shape: f32[1,32], index: 4, kind: input, shape index: {}]   ;;  %s6600_s5 = inlined_call_operand.vmem [shape: f32[1,32], index: 5, kind: input, shape index: {}]   ;;  %s6601_s6 = inlined_call_operand.<no memory space> [shape: f32[1,1], index: 6, kind: input, shape index: {}]   ;;  %s6602_s7 = inlined_call_operand.hbm [shape: f32[16,8,32], index: 7, kind: output, shape index: {}]  }
   0x1   :  { %12 = sst [smem:[#allocation2]] %s6601_s6 }
   0x2   :  { %13 = vsyncpa [#allocation4], 0 }
   0x3   :  { %14 = vsyncpa [#allocation5], 0 }
   0x4   :  { %16 = vsyncpa [#allocation5 + $0x1], 0  ;;  %s5646_s26 = smov 0   ;;  %s5648_s27 = smov 0  }
   0x5   :  { %s5650_s28 = smov 0   ;;  %s5652_s29 = smov 0  }
   0x6 LB: > { %s5667_s6 = sadd.s32 4294967295, %s5592_s29   ;;  %s4739_s30 = sadd.s32 4294967294, %s5592_s29   ;;  %s5592_s29 = sphi %s5652_s29, %s6645_s29   ;;  %s5588_s28 = sphi %s5650_s28, %s6644_s28   ;;  %s5584_s27 = sphi %s5648_s27, %s6643_s27   ;;  %s5580_s26 = sphi %s5646_s26, %s6642_s26  }
   0x7   : > { %s5671_s8 = sadd.s32 1, %s5592_s29   ;;  %s186_s9 = sadd.s32 1, %s5588_s28 }
   0x8   : > { %s183_s10 = ssub.s32 %s5592_s29, %s5671_s8  ;;  %p196_p0 = scmp.ne.s32.totalorder %s5588_s28, %s5584_s27 }
   0x9   : > { %p184_p1 = scmp.eq.s32.totalorder %s183_s10, 0  ;;  %p197_p2 = scmp.eq.s32.totalorder %s5667_s6, 1 }
   0xa   : > { %p202_p3 = scmp.ne.s32.totalorder %s5584_s27, %s5580_s26  ;;  %p203_p4 = scmp.eq.s32.totalorder %s4739_s30, 1 }
   0xb   : > { %s5682_s11 = scalar_select %p184_p1, %s5588_s28, %s186_s9  }
   0xc   : > { %p5684_p5 = por %p197_p2, %p196_p0  ;;  %p5688_p6 = por %p203_p4, %p202_p3 }
   0xd   : > { %p4740_p7 = scmp.ge.s32.totalorder %s5592_s29, 1  ;;  %p210_p8 = scmp.lt.s32.totalorder %s5592_s29, 3 }
   0xe   : > { %s6616_s12 = scalar_select %p5684_p5, 1, 0 }
   0xf   : > { %s6617_s13 = scalar_select %p5688_p6, 1, 0 }
  0x10   : > { %p6603_p9 = scmp.eq.s32.totalorder %s5667_s6, 0  ;;  %p5695_p10 = pnand %p4740_p7, %p210_p8 }
  0x11   : > { %s5594_s15 = smov [#allocation3]   ;;  %s5498_s20 = scalar_lea.hbm %s6597_s2, 512 }
  0x12   : > { %s6618_s14 = scalar_select %p5695_p10, 1, 0 }
  0x13   : > { %s222_s16 = sshll.u32 %s5594_s15, 4  ;;  %p5343_p11 = pneg %p5695_p10  ;;  %s223_s16 = int_to_ptr.vmem [resolvable:$true] %s222_s16 }
  0x14   : > { %p5499_p13 = scmp.ne.s32.totalorder %s6597_s2, %s5498_s20  ;;  %p5505_p3 = scmp.lt.u32.totalorder %s5498_s20, %s6597_s2 }
  0x15   : > { %p5703_p12 = pnand %p6603_p9, %p5343_p11 }
  0x17   : > { %p5500_p0 = pneg %p5703_p12 }
  0x19   : > { %p5501_p1 = pnand %p5500_p0, %p5499_p13 }
  0x1b   : > { %p5502_p2 = pneg %p5501_p1 }
  0x1d   : > { %p5507_p4 = pnand %p5505_p3, %p5502_p2 }
  0x1f   : > { %5510 = shalt.err (!%p5507_p4)
}
  0x20   : > { %s5511_s25 = scalar_lea.vmem %s223_s16, 512  ;;  %p5519_p9 = scmp.lt.s32.totalorder %s223_s16, %s223_s16 }
  0x21   : > { %p5512_p7 = scmp.ne.s32.totalorder %s223_s16, %s5511_s25  ;;  %p5520_p6 = scmp.lt.s32.totalorder %s5511_s25, %s5511_s25 }
  0x23   : > { %p5514_p8 = pnand %p5512_p7, %p5500_p0  ;;  %p5521_p5 = por %p5520_p6, %p5519_p9 }
  0x25   : > { %p5515_p11 = pneg %p5514_p8 }
  0x27   : > { %p5522_p10 = pnand %p5521_p5, %p5515_p11 }
  0x29   : > { %5525 = shalt.err (!%p5522_p10)
}
  0x2a   : > { %s5595_s30 = smov 128   ;;  %s5596_s9 = smov 8  }
  0x2b   : > { %5346 = dma.hbm_to_vmem [thread:$0]  (!%p5703_p12), %s6597_s2, 512, %s223_s16, [#allocation4], %s5595_s30, %s5595_s30, %s5596_s9  }
  0x2c   : > { %p6620_p13 = scmp.ne.s32.totalorder %s6618_s14, 0 }
  0x2e   : > { %268 = sbr.rel (%p6620_p13) target bundleno = 1364 (0x554), region = 48 }
  0x35   : > { %p6621_p1 = scmp.eq.s32.totalorder %s5667_s6, 0 }
  0x37   : > { %5571 = dma.done.wait (%p6621_p1), [#allocation4], 512   ;;  %p6622_p0 = pmov %p6621_p1 }
  0x38   : > { %s4746_s18 = sshll.u32 %s5667_s6, 3  ;;  %vm338_vm0 = vcmask 261120   ;;  %v334_v0 = vld [vmem:[#allocation3] sm:$0xff]  ;;  %v335_v1 = vld [vmem:[#allocation3 + $0x8] sm:$0xff]  ;;  %v336_v2 = vld [vmem:[#allocation3 + $0x10] sm:$0xff]  ;;  %vm476_vm1 = vcmask 523264  }
  0x39   : > { %5573 = vsyncadd (%p6622_p0), [#allocation4], 4294966784  ;;  %p306_p5 = scmp.lt.s32.totalorder %s4746_s18, 15  ;;  %v5266_v3 = vpack.c.bf16 %v335_v1, %v334_v0  ;;  %v337_v4 = vld [vmem:[#allocation3 + $0x18] sm:$0xff]  ;;  %v468_v7 = vld [vmem:[%s6598_s3] sm:$0xff]  ;;  %s5597_s24 = smov 96  }
  0x3a   : > { %v5270_v6 = vpack.c.bf16 %v337_v4, %v336_v2  ;;  %v469_v8 = vld [vmem:[%s6598_s3 + $0x8] sm:$0xff]  ;;  %v470_v10 = vld [vmem:[%s6598_s3 + $0x10] sm:$0xff]  ;;  %v471_v11 = vld [vmem:[%s6598_s3 + $0x18] sm:$0xff]  ;;  %v6606_v34 = vmov 0.0   ;;  %vm5599_vm2 = vmmov 0   ;;  %vm1782_vm6 = vcmask 64512  }
  0x3b   : > { %s6647_s18 = smov (!%p306_p5, %s4746_s18), 15  ;;  %5267 = vmatprep.subr.bf16.mxu0 %v5266_v3  ;;  %v5274_v9 = vpack.c.bf16 %v469_v8, %v468_v7  ;;  %v5278_v12 = vpack.c.bf16 %v471_v11, %v470_v10  ;;  %v472_v13 = vld [vmem:[%s6598_s3 + $0x20] sm:$0xff]  ;;  %v473_v14 = vld [vmem:[%s6598_s3 + $0x28] sm:$0xff]  ;;  %v474_v18 = vld [vmem:[%s6598_s3 + $0x30] sm:$0xff]  ;;  %s302_s19 = sand.u32 1, %s5584_s27  }
  0x3c   : > { %s4747_s17 = sshll.u32 %s6647_s18, 3  ;;  %5269 = vmatpush3.bf16.msra.mxu0 %v5266_v3  ;;  %v5282_v17 = vpack.c.bf16 %v473_v14, %v472_v13  ;;  %v475_v19 = vld [vmem:[%s6598_s3 + $0x38] sm:$0xff]  ;;  %s4745_s16 = sshll.u32 %s302_s19, 6 }
  0x3d   : > { %s5738_s14 = scalar_lea.vmem %s6595_s0, %s4747_s17  ;;  %5271 = vmatprep.subr.bf16.mxu0 %v5270_v6  ;;  %5275 = vmatprep.subr.bf16.mxu1 %v5274_v9  ;;  %v5286_v22 = vpack.c.bf16 %v475_v19, %v474_v18  ;;  %s6071_s9 = scalar_lea.vmem %s6596_s1, %s4747_s17 }
  0x3e   : > { %v318_v5 = vld [vmem:[%s5738_s14] sm:$0xff]  ;;  %v319_v15 = vld [vmem:[%s5738_s14 + $0x8] sm:$0xff]  ;;  %5277 = vmatpush3.bf16.msra.mxu1 %v5274_v9  ;;  %v320_v16 = vld [vmem:[%s5738_s14 + $0x10] sm:$0xff]  ;;  %s6504_s20 = scalar_lea.vmem [#allocation6], %s4745_s16  ;;  %s4853_s21 = sshll.u32 %s5667_s6, 10 }
  0x3f   : > { %4986 = vmatprep.mubr.msk.f32.mxu0 %vm338_vm0, %v318_v5  ;;  %5279 = vmatprep.subr.bf16.mxu1 %v5278_v12  ;;  %v321_v20 = vld [vmem:[%s5738_s14 + $0x18] sm:$0xff]  ;;  %v322_v21 = vld [vmem:[%s5738_s14 + $0x20] sm:$0xff]  ;;  %v323_v23 = vld [vmem:[%s5738_s14 + $0x28] sm:$0xff]  ;;  %s4653_s22 = sshll.u32 %s6504_s20, 4  ;;  %s6546_s25 = scalar_lea.hbm %s6602_s7, %s4853_s21  ;;  %s6548_s22 = int_to_ptr.vmem [resolvable:$true] %s4653_s22 }
  0x40   : > { %5273 = vmatpush3.bf16.msra.mxu0 %v5270_v6  ;;  %v324_v24 = vld [vmem:[%s5738_s14 + $0x30] sm:$0xff]  ;;  %v325_v25 = vld [vmem:[%s5738_s14 + $0x38] sm:$0xff]  ;;  %s6554_s6 = scalar_lea.sflag [#allocation5], %s302_s19  ;;  %s5526_s30 = scalar_lea.vmem %s6548_s22, 1024 }
  0x41   : > { %5031 = vmatprep.subr.mxu0 %v6606_v34  ;;  %v6074_v14 = vld [vmem:[%s6071_s9 + $0x18] sm:$0xff]  ;;  %p5527_p6 = scmp.ne.s32.totalorder %s6548_s22, %s5526_s30  ;;  %p6640_p9 = scmp.ne.s32.totalorder %s6616_s12, 0 }
  0x42   : > { %5281 = vmatpush3.bf16.msra.mxu1 %v5278_v12  ;;  %vm609_vm3 = vcmp.gt.f32.partialorder %v6074_v14, 0.0 }
  0x43   : > { %4987 = vmatmul.mubr.msk.f32.vlgmr.msra.gmra.mrb[0].mxu0 %vm338_vm0, %v319_v15  ;;  %5283 = vmatprep.subr.bf16.mxu1 %v5282_v17  ;;  %v6077_v15 = vld [vmem:[%s6071_s9] sm:$0xff]  ;;  %p5528_p10 = pnand %p5527_p6, %p6640_p9 }
  0x44   : > { %4989 = vmatprep.mubr.msk.f32.mxu0 %vm338_vm0, %v320_v16  ;;  %v6080_v16 = vld [vmem:[%s6071_s9 + $0x8] sm:$0xff]  ;;  %vm606_vm4 = vcmp.gt.f32.partialorder %v6077_v15, 0.0 }
  0x45   : > { %vm607_vm5 = vcmp.gt.f32.partialorder %v6080_v16, 0.0  ;;  %p5529_p12 = pneg %p5528_p10 }
  0x46   : > { %5285 = vmatpush3.bf16.msra.mxu1 %v5282_v17  ;;  %v6085_v17 = vld [vmem:[%s6071_s9 + $0x28] sm:$0xff] }
  0x47   : > { %4990 = vmatmul.mubr.msk.f32.gmra.mrb[2].mxu0 %vm338_vm0, %v321_v20  ;;  %5287 = vmatprep.subr.bf16.mxu1 %v5286_v22  ;;  %vm611_vm7 = vcmp.gt.f32.partialorder %v6085_v17, 0.0 }
  0x48   : > { %4992 = vmatprep.mubr.msk.f32.mxu0 %vm338_vm0, %v322_v21 }
  0x4a   : > { %5289 = vmatpush3.bf16.msra.mxu1 %v5286_v22 }
  0x4b   : > { %4993 = vmatmul.mubr.msk.f32.gmra.mrb[4].mxu0 %vm338_vm0, %v323_v23  ;;  %5026 = vmatprep.subr.mxu1 %v6606_v34 }
  0x4c   : > { %4995 = vmatprep.mubr.msk.f32.mxu0 %vm338_vm0, %v324_v24 }
  0x4f   : > { %4996 = vmatmul.mubr.msk.f32.gmra.mrb[6].mxu0 %vm338_vm0, %v325_v25  ;;  %v6112_v25 = vld [vmem:[%s6071_s9 + $0x38] sm:$0xff] }
  0x50   : > { %5033 = vmatprep.mubr.msk.f32.mxu0 %vm5599_vm2, %v6606_v34  ;;  %vm613_vm8 = vcmp.gt.f32.partialorder %v6112_v25, 0.0 }
 0x116   : > { %v5780_v26 = vpop.f32.mrb[0].mxu0 }
 0x117   : > { %6623 = vst [vmem:[#allocation9_spill] sm:$0xff] %v5780_v26  ;;  %2021 = vrot.lane.b32.xlu1 %v5780_v26, %s5597_s24  ;;  %v5784_v27 = vpop.f32.mrb[1].mxu0 }
 0x118   : > { %1943 = vrot.lane.b32.xlu0 %v5784_v27, %s5597_s24  ;;  %5014 = vmatprep.mubr.msk.f32.mxu1 %vm476_vm1, %v5784_v27 }
 0x119   : > { %5015 = vmatmul.mubr.msk.f32.vlgmr.msra.gmra.mrb[0].mxu1 %vm476_vm1, %v5780_v26 }
 0x11a   : > { %v5792_v28 = vpop.f32.mrb[2].mxu0 }
 0x11b   : > { %v5794_v29 = vpop.f32.mrb[3].mxu0 }
 0x11c   : > { %6624 = vst [vmem:[#allocation10_spill] sm:$0xff] %v5794_v29  ;;  %5017 = vmatprep.mubr.msk.f32.mxu1 %vm476_vm1, %v5794_v29 }
 0x11d   : > { %5018 = vmatmul.mubr.msk.f32.gmra.mrb[2].mxu1 %vm476_vm1, %v5792_v28 }
 0x11e   : > { %v5800_v30 = vpop.f32.mrb[4].mxu0 }
 0x11f   : > { %v5802_v31 = vpop.f32.mrb[5].mxu0 }
 0x120   : > { %6625 = vst [vmem:[#allocation11_spill] sm:$0xff] %v5802_v31  ;;  %5020 = vmatprep.mubr.msk.f32.mxu1 %vm476_vm1, %v5802_v31 }
 0x121   : > { %5021 = vmatmul.mubr.msk.f32.gmra.mrb[4].mxu1 %vm476_vm1, %v5800_v30 }
 0x122   : > { %v5808_v32 = vpop.f32.mrb[6].mxu0 }
 0x123   : > { %6626 = vst [vmem:[#allocation12_spill] sm:$0xff] %v5808_v32  ;;  %v5810_v33 = vpop.f32.mrb[7].mxu0 }
 0x124   : > { %6627 = vst [vmem:[#allocation13_spill] sm:$0xff] %v5810_v33  ;;  %5023 = vmatprep.mubr.msk.f32.mxu1 %vm476_vm1, %v5810_v33 }
 0x125   : > { %5024 = vmatmul.mubr.msk.f32.gmra.mrb[6].mxu1 %vm476_vm1, %v5808_v32 }
 0x126   : > { %5028 = vmatprep.mubr.msk.f32.mxu1 %vm5599_vm2, %v6606_v34 }
 0x189   : > { %v5948_v43 = vpop.permute.xlu1 %2021 }
 0x18a   : > { %v5950_v44 = vpop.permute.xlu0 %1943 }
 0x1ec   : > { %v5822_v35 = vpop.f32.mrb[0].mxu1 }
 0x1ed   : > { %2023 = vrot.lane.b32.xlu1 %v5822_v35, %s5597_s24  ;;  %v567_v36 = vpop.f32.mrb[1].mxu1  ;;  %5032 = vmatpush3.xpose.msk.msra.mxu0 %vm338_vm0, %v5822_v35 }
 0x1ee   : > { %1945 = vrot.lane.b32.xlu0 %v567_v36, %s5597_s24  ;;  %5027 = vmatpush3.xpose.msk.msra.mxu1 %vm338_vm0, %v567_v36 }
 0x1ef   : > { %5036 = vmatprep.subr.mxu0 %v6606_v34  ;;  %5041 = vmatprep.subr.mxu1 %v6606_v34 }
 0x1f0   : > { %v5019_v37 = vpop.f32.mrb[2].mxu1  ;;  %5034 = vmatmul.mubr.msk.f32.vlgmr.msra.gmra.mrb[8].mxu0 %vm338_vm0, %v5780_v26 }
 0x1f1   : > { %2177 = vrot.lane.b32.xlu1 %v5792_v28, %s5597_s24  ;;  %v5836_v38 = vpop.f32.mrb[3].mxu1  ;;  %5029 = vmatmul.mubr.msk.f32.vlgmr.msra.gmra.mrb[8].mxu1 %vm338_vm0, %v5784_v27 }
 0x1f2   : > { %2179 = vrot.lane.b32.xlu0 %v5019_v37, %s5597_s24  ;;  %5037 = vmatpush3.xpose.msk.msra.mxu0 %vm338_vm0, %v5836_v38 }
 0x1f3   : > { %5042 = vmatpush3.xpose.msk.msra.mxu1 %vm338_vm0, %v5019_v37  ;;  %5038 = vmatprep.mubr.msk.f32.mxu0 %vm5599_vm2, %v6606_v34 }
 0x1f4   : > { %v5022_v39 = vpop.f32.mrb[4].mxu1  ;;  %5043 = vmatprep.mubr.msk.f32.mxu1 %vm5599_vm2, %v6606_v34  ;;  %5046 = vmatprep.subr.mxu0 %v6606_v34 }
 0x1f5   : > { %5039 = vmatmul.mubr.msk.f32.vlgmr.msra.gmra.mrb[10].mxu0 %vm338_vm0, %v5794_v29  ;;  %2333 = vrot.lane.b32.xlu1 %v5800_v30, %s5597_s24  ;;  %v587_v40 = vpop.f32.mrb[5].mxu1 }
 0x1f6   : > { %5044 = vmatmul.mubr.msk.f32.vlgmr.msra.gmra.mrb[10].mxu1 %vm338_vm0, %v5792_v28  ;;  %5051 = vmatprep.subr.mxu1 %v6606_v34 }
 0x1f7   : > { %2101 = vrot.lane.b32.xlu0 %v5836_v38, %s5597_s24  ;;  %5047 = vmatpush3.xpose.msk.msra.mxu0 %vm338_vm0, %v587_v40 }
 0x1f8   : > { %5052 = vmatpush3.xpose.msk.msra.mxu1 %vm338_vm0, %v5022_v39  ;;  %v5025_v41 = vpop.f32.mrb[6].mxu1  ;;  %5048 = vmatprep.mubr.msk.f32.mxu0 %vm5599_vm2, %v6606_v34 }
 0x1f9   : > { %5053 = vmatprep.mubr.msk.f32.mxu1 %vm5599_vm2, %v6606_v34  ;;  %5056 = vmatprep.subr.mxu0 %v6606_v34  ;;  %v597_v42 = vpop.f32.mrb[7].mxu1 }
 0x1fa   : > { %5049 = vmatmul.mubr.msk.f32.vlgmr.msra.gmra.mrb[12].mxu0 %vm338_vm0, %v5802_v31  ;;  %5061 = vmatprep.subr.mxu1 %v6606_v34 }
 0x1fb   : > { %5054 = vmatmul.mubr.msk.f32.vlgmr.msra.gmra.mrb[12].mxu1 %vm338_vm0, %v5800_v30  ;;  %2491 = vrot.lane.b32.xlu1 %v5025_v41, %s5597_s24 }
 0x1fc   : > { %2335 = vrot.lane.b32.xlu0 %v5022_v39, %s5597_s24  ;;  %5057 = vmatpush3.xpose.msk.msra.mxu0 %vm338_vm0, %v597_v42 }
 0x1fd   : > { %5062 = vmatpush3.xpose.msk.msra.mxu1 %vm338_vm0, %v5025_v41  ;;  %5058 = vmatprep.mubr.msk.f32.mxu0 %vm5599_vm2, %v6606_v34 }
 0x1fe   : > { %5063 = vmatprep.mubr.msk.f32.mxu1 %vm5599_vm2, %v6606_v34  ;;  %5066 = vmatprep.subr.mxu0 %v6606_v34 }
 0x1ff   : > { %2489 = vrot.lane.b32.xlu1 %v5808_v32, %s5597_s24  ;;  %5059 = vmatmul.mubr.msk.f32.vlgmr.msra.gmra.mrb[14].mxu0 %vm338_vm0, %v5810_v33 }
 0x200   : > { %5064 = vmatmul.mubr.msk.f32.vlgmr.msra.gmra.mrb[14].mxu1 %vm338_vm0, %v5808_v32  ;;  %5081 = vmatprep.subr.mxu1 %v6606_v34 }
 0x201   : > { %2099 = vrot.lane.b32.xlu0 %v5794_v29, %s5597_s24  ;;  %5067 = vmatpush3.xpose.msk.msra.mxu0 %vm338_vm0, %v5784_v27 }
 0x202   : > { %5082 = vmatpush3.xpose.msk.msra.mxu1 %vm338_vm0, %v5792_v28  ;;  %5068 = vmatprep.mubr.msk.f32.mxu0 %vm5599_vm2, %v6606_v34 }
 0x203   : > { %5083 = vmatprep.mubr.msk.f32.mxu1 %vm5599_vm2, %v6606_v34  ;;  %2255 = vrot.lane.b32.xlu1 %v5802_v31, %s5597_s24 }
 0x204   : > { %5069 = vmatmul.mubr.msk.f32.vlgmr.msra.gmra.mrb[16].mxu0 %vm338_vm0, %v567_v36  ;;  %5071 = vmatprep.subr.mxu0 %v6606_v34 }
 0x205   : > { %5084 = vmatmul.mubr.msk.f32.vlgmr.msra.gmra.mrb[10].mxu1 %vm338_vm0, %v5019_v37  ;;  %5091 = vmatprep.subr.mxu1 %v6606_v34 }
 0x206   : > { %2257 = vrot.lane.b32.xlu0 %v587_v40, %s5597_s24  ;;  %5072 = vmatpush3.xpose.msk.msra.mxu0 %vm338_vm0, %v5780_v26 }
 0x207   : > { %5092 = vmatpush3.xpose.msk.msra.mxu1 %vm338_vm0, %v5800_v30  ;;  %5073 = vmatprep.mubr.msk.f32.mxu0 %vm5599_vm2, %v6606_v34 }
 0x208   : > { %5093 = vmatprep.mubr.msk.f32.mxu1 %vm5599_vm2, %v6606_v34  ;;  %2411 = vrot.lane.b32.xlu1 %v5810_v33, %s5597_s24 }
 0x209   : > { %5074 = vmatmul.mubr.msk.f32.vlgmr.msra.gmra.mrb[8].mxu0 %vm338_vm0, %v5822_v35  ;;  %5076 = vmatprep.subr.mxu0 %v6606_v34 }
 0x20a   : > { %5094 = vmatmul.mubr.msk.f32.vlgmr.msra.gmra.mrb[12].mxu1 %vm338_vm0, %v5022_v39  ;;  %5101 = vmatprep.subr.mxu1 %v6606_v34 }
 0x20b   : > { %5102 = vmatpush3.xpose.msk.msra.mxu1 %vm338_vm0, %v5808_v32  ;;  %2413 = vrot.lane.b32.xlu0 %v597_v42, %s5597_s24 }
 0x20c   : > { %5077 = vmatpush3.xpose.msk.msra.mxu0 %vm338_vm0, %v5794_v29  ;;  %5078 = vmatprep.mubr.msk.f32.mxu0 %vm5599_vm2, %v6606_v34 }
 0x20d   : > { %5103 = vmatprep.mubr.msk.f32.mxu1 %vm5599_vm2, %v6606_v34  ;;  %5086 = vmatprep.subr.mxu0 %v6606_v34 }
 0x20e   : > { %5104 = vmatmul.mubr.msk.f32.vlgmr.msra.gmra.mrb[14].mxu1 %vm338_vm0, %v5025_v41  ;;  %5106 = vmatprep.subr.mxu1 %v6606_v34 }
 0x20f   : > { %5079 = vmatmul.mubr.msk.f32.vlgmr.msra.gmra.mrb[10].mxu0 %vm338_vm0, %v5836_v38  ;;  %5108 = vmatprep.mubr.msk.f32.mxu1 %vm5599_vm2, %v6606_v34  ;;  %v6117_v38 = vld [vmem:[%s6071_s9 + $0x10] sm:$0xff] }
 0x210   : > { %5087 = vmatpush3.xpose.msk.msra.mxu0 %vm338_vm0, %v5802_v31  ;;  %5088 = vmatprep.mubr.msk.f32.mxu0 %vm5599_vm2, %v6606_v34  ;;  %vm608_vm9 = vcmp.gt.f32.partialorder %v6117_v38, 0.0 }
 0x211   : > { %5096 = vmatprep.subr.mxu0 %v6606_v34 }
 0x213   : > { %5089 = vmatmul.mubr.msk.f32.vlgmr.msra.gmra.mrb[12].mxu0 %vm338_vm0, %v587_v40 }
 0x214   : > { %5097 = vmatpush3.xpose.msk.msra.mxu0 %vm338_vm0, %v5810_v33  ;;  %5098 = vmatprep.mubr.msk.f32.mxu0 %vm5599_vm2, %v6606_v34 }
 0x215   : > { %5116 = vmatprep.subr.mxu0 %v6606_v34 }
 0x217   : > { %5099 = vmatmul.mubr.msk.f32.vlgmr.msra.gmra.mrb[14].mxu0 %vm338_vm0, %v597_v42 }
 0x218   : > { %5118 = vmatprep.mubr.msk.f32.mxu0 %vm5599_vm2, %v6606_v34 }
 0x25f   : > { %v2024_v45 = vpop.permute.xlu1 %2023 }
 0x260   : > { %v1946_v46 = vpop.permute.xlu0 %1945 }
 0x261   : > { %5107 = vmatpush3.xpose.msk.msra.mxu1 %vm338_vm0, %v1946_v46 }
 0x262   : > { %5111 = vmatprep.subr.mxu1 %v6606_v34 }
 0x263   : > { %v5954_v47 = vpop.permute.xlu1 %2177 }
 0x264   : > { %v2180_v48 = vpop.permute.xlu0 %2179  ;;  %5109 = vmatmul.mubr.msk.f32.vlgmr.msra.gmra.mrb[16].mxu1 %vm338_vm0, %v5950_v44 }
 0x265   : > { %5112 = vmatpush3.xpose.msk.msra.mxu1 %vm338_vm0, %v2024_v45  ;;  %5113 = vmatprep.mubr.msk.f32.mxu1 %vm5599_vm2, %v6606_v34 }
 0x266   : > { %5121 = vmatprep.subr.mxu1 %v6606_v34 }
 0x267   : > { %v5962_v49 = vpop.permute.xlu1 %2333 }
 0x268   : > { %5114 = vmatmul.mubr.msk.f32.vlgmr.msra.gmra.mrb[18].mxu1 %vm338_vm0, %v5948_v43 }
 0x269   : > { %v2102_v50 = vpop.permute.xlu0 %2101  ;;  %5122 = vmatpush3.xpose.msk.msra.mxu1 %vm338_vm0, %v2180_v48  ;;  %5123 = vmatprep.mubr.msk.f32.mxu1 %vm5599_vm2, %v6606_v34 }
 0x26a   : > { %5117 = vmatpush3.xpose.msk.msra.mxu0 %vm338_vm0, %v2102_v50  ;;  %5131 = vmatprep.subr.mxu1 %v6606_v34 }
 0x26b   : > { %5126 = vmatprep.subr.mxu0 %v6606_v34 }
 0x26c   : > { %5124 = vmatmul.mubr.msk.f32.vlgmr.msra.gmra.mrb[20].mxu1 %vm338_vm0, %v5954_v47 }
 0x26d   : > { %5133 = vmatprep.mubr.msk.f32.mxu1 %vm5599_vm2, %v6606_v34  ;;  %v2492_v51 = vpop.permute.xlu1 %2491 }
 0x26e   : > { %v2336_v52 = vpop.permute.xlu0 %2335 }
 0x26f   : > { %5132 = vmatpush3.xpose.msk.msra.mxu1 %vm338_vm0, %v2336_v52 }
 0x270   : > { %5141 = vmatprep.subr.mxu1 %v6606_v34 }
 0x271   : > { %v5985_v54 = vpop.permute.xlu1 %2489 }
 0x272   : > { %5134 = vmatmul.mubr.msk.f32.vlgmr.msra.gmra.mrb[22].mxu1 %vm338_vm0, %v5962_v49 }
 0x273   : > { %v5980_v53 = vpop.permute.xlu0 %2099  ;;  %5142 = vmatpush3.xpose.msk.msra.mxu1 %vm338_vm0, %v2492_v51  ;;  %5143 = vmatprep.mubr.msk.f32.mxu1 %vm5599_vm2, %v6606_v34 }
 0x274   : > { %5119 = vmatmul.mubr.msk.f32.vlgmr.msra.gmra.mrb[18].mxu0 %vm338_vm0, %v5980_v53  ;;  %5146 = vmatprep.subr.mxu1 %v6606_v34 }
 0x275   : > { %5128 = vmatprep.mubr.msk.f32.mxu0 %vm5599_vm2, %v6606_v34  ;;  %v6000_v56 = vpop.permute.xlu1 %2255 }
 0x276   : > { %5144 = vmatmul.mubr.msk.f32.vlgmr.msra.gmra.mrb[24].mxu1 %vm338_vm0, %v5985_v54 }
 0x277   : > { %5147 = vmatpush3.xpose.msk.msra.mxu1 %vm338_vm0, %v5950_v44  ;;  %5148 = vmatprep.mubr.msk.f32.mxu1 %vm5599_vm2, %v6606_v34 }
 0x278   : > { %v2258_v55 = vpop.permute.xlu0 %2257  ;;  %5151 = vmatprep.subr.mxu1 %v6606_v34 }
 0x279   : > { %5127 = vmatpush3.xpose.msk.msra.mxu0 %vm338_vm0, %v2258_v55 }
 0x27a   : > { %5149 = vmatmul.mubr.msk.f32.vlgmr.msra.gmra.mrb[16].mxu1 %vm338_vm0, %v1946_v46  ;;  %5136 = vmatprep.subr.mxu0 %v6606_v34  ;;  %v6018_v58 = vpop.permute.xlu1 %2411 }
 0x27b   : > { %5152 = vmatpush3.xpose.msk.msra.mxu1 %vm338_vm0, %v5948_v43  ;;  %5153 = vmatprep.mubr.msk.f32.mxu1 %vm5599_vm2, %v6606_v34 }
 0x27c   : > { %5129 = vmatmul.mubr.msk.f32.vlgmr.msra.gmra.mrb[20].mxu0 %vm338_vm0, %v6000_v56  ;;  %5161 = vmatprep.subr.mxu1 %v6606_v34 }
 0x27d   : > { %v2414_v57 = vpop.permute.xlu0 %2413  ;;  %5138 = vmatprep.mubr.msk.f32.mxu0 %vm5599_vm2, %v6606_v34 }
 0x27e   : > { %5137 = vmatpush3.xpose.msk.msra.mxu0 %vm338_vm0, %v2414_v57  ;;  %5154 = vmatmul.mubr.msk.f32.vlgmr.msra.gmra.mrb[18].mxu1 %vm338_vm0, %v2024_v45 }
 0x27f   : > { %5156 = vmatprep.subr.mxu0 %v6606_v34  ;;  %5162 = vmatpush3.xpose.msk.msra.mxu1 %vm338_vm0, %v5954_v47 }
 0x280   : > { %5163 = vmatprep.mubr.msk.f32.mxu1 %vm5599_vm2, %v6606_v34  ;;  %5171 = vmatprep.subr.mxu1 %v6606_v34 }
 0x281   : > { %5139 = vmatmul.mubr.msk.f32.vlgmr.msra.gmra.mrb[22].mxu0 %vm338_vm0, %v6018_v58 }
 0x282   : > { %5157 = vmatpush3.xpose.msk.msra.mxu0 %vm338_vm0, %v5980_v53  ;;  %5158 = vmatprep.mubr.msk.f32.mxu0 %vm5599_vm2, %v6606_v34 }
 0x283   : > { %5164 = vmatmul.mubr.msk.f32.vlgmr.msra.gmra.mrb[20].mxu1 %vm338_vm0, %v2180_v48  ;;  %5166 = vmatprep.subr.mxu0 %v6606_v34 }
 0x284   : > { %5172 = vmatpush3.xpose.msk.msra.mxu1 %vm338_vm0, %v5962_v49  ;;  %5173 = vmatprep.mubr.msk.f32.mxu1 %vm5599_vm2, %v6606_v34 }
 0x285   : > { %5159 = vmatmul.mubr.msk.f32.vlgmr.msra.gmra.mrb[18].mxu0 %vm338_vm0, %v2102_v50  ;;  %5181 = vmatprep.subr.mxu1 %v6606_v34 }
 0x286   : > { %5167 = vmatpush3.xpose.msk.msra.mxu0 %vm338_vm0, %v6000_v56  ;;  %5168 = vmatprep.mubr.msk.f32.mxu0 %vm5599_vm2, %v6606_v34 }
 0x287   : > { %5174 = vmatmul.mubr.msk.f32.vlgmr.msra.gmra.mrb[22].mxu1 %vm338_vm0, %v2336_v52  ;;  %5176 = vmatprep.subr.mxu0 %v6606_v34 }
 0x288   : > { %5182 = vmatpush3.xpose.msk.msra.mxu1 %vm338_vm0, %v5985_v54  ;;  %5183 = vmatprep.mubr.msk.f32.mxu1 %vm5599_vm2, %v6606_v34 }
 0x289   : > { %5169 = vmatmul.mubr.msk.f32.vlgmr.msra.gmra.mrb[20].mxu0 %vm338_vm0, %v2258_v55  ;;  %5201 = vmatprep.subr.mxu1 %v6606_v34 }
 0x28a   : > { %5177 = vmatpush3.xpose.msk.msra.mxu0 %vm338_vm0, %v6018_v58  ;;  %5178 = vmatprep.mubr.msk.f32.mxu0 %vm5599_vm2, %v6606_v34 }
 0x28b   : > { %5184 = vmatmul.mubr.msk.f32.vlgmr.msra.gmra.mrb[24].mxu1 %vm338_vm0, %v2492_v51  ;;  %5186 = vmatprep.subr.mxu0 %v6606_v34 }
 0x28c   : > { %5202 = vmatpush3.msra.mxu1 %v5954_v47  ;;  %5203 = vmatprep.mubr.msk.f32.mxu1 %vm5599_vm2, %v6606_v34 }
 0x28d   : > { %5179 = vmatmul.mubr.msk.f32.vlgmr.msra.gmra.mrb[22].mxu0 %vm338_vm0, %v2414_v57  ;;  %5211 = vmatprep.subr.mxu1 %v6606_v34  ;;  %v6134_v57 = vld [vmem:[%s6071_s9 + $0x20] sm:$0xff] }
 0x28e   : > { %5187 = vmatpush3.msra.mxu0 %v5950_v44  ;;  %5188 = vmatprep.mubr.msk.f32.mxu0 %vm5599_vm2, %v6606_v34  ;;  %vm610_vm10 = vcmp.gt.f32.partialorder %v6134_v57, 0.0 }
 0x28f   : > { %5191 = vmatprep.subr.mxu0 %v6606_v34 }
 0x2c4   : > { %v685_v59 = vpop.f32.mrb[8].mxu1 }
 0x2c5   : > { %v5030_v60 = vpop.f32.mrb[9].mxu1 }
 0x2d7   : > { %v1280_v61 = vpop.f32.mrb[16].mxu0 }
 0x2d8   : > { %v1281_v62 = vadd.f32 %v1280_v61, %v685_v59  ;;  %v1490_v63 = vpop.f32.mrb[10].mxu1  ;;  %v5070_v0 = vpop.f32.mrb[17].mxu0 }
 0x2d9   : > { %v5085_v1 = vpop.f32.mrb[11].mxu1  ;;  %v6090_v18 = vsel %vm609_vm3, %v1490_v63, -1e+25 }
 0x2da   : > { %v6094_v19 = vsel %vm606_vm4, %v1281_v62, -1e+25  ;;  %v1804_v21 = vsel %vm1782_vm6, %v6090_v18, -inf }
 0x2db   : > { %v1783_v22 = vsel %vm1782_vm6, %v6094_v19, -inf  ;;  %v1805_v35 = vrot.slane %v1804_v21, 4 }
 0x2dc   : > { %v1350_v2 = vpop.f32.mrb[8].mxu0  ;;  %v1784_v36 = vrot.slane %v1783_v22, 4 }
 0x2dd   : > { %v1630_v3 = vpop.f32.mrb[12].mxu1  ;;  %v5075_v4 = vpop.f32.mrb[9].mxu0  ;;  %v6099_v20 = vsel %vm607_vm5, %v1350_v2, -1e+25  ;;  %v1806_v40 = vmax.f32 %v1804_v21, %v1805_v35  ;;  %v6144_v21 = vld [vmem:[%s6071_s9 + $0x30] sm:$0xff]  ;;  %s5600_s9 = smov [#allocation6]  }
 0x2de   : > { %v5095_v5 = vpop.f32.mrb[13].mxu1  ;;  %v6107_v23 = vsel %vm611_vm7, %v1630_v3, -1e+25  ;;  %v1790_v24 = vsel %vm1782_vm6, %v6099_v20, -inf  ;;  %v1785_v42 = vmax.f32 %v1783_v22, %v1784_v36  ;;  %vm612_vm11 = vcmp.gt.f32.partialorder %v6144_v21, 0.0  ;;  %s5530_s18 = sshll.u32 %s5600_s9, 4  ;;  %s5531_s18 = int_to_ptr.vmem [resolvable:$false] %s5530_s18 }
 0x2df   : > { %v1818_v37 = vsel %vm1782_vm6, %v6107_v23, -inf  ;;  %v1791_v39 = vrot.slane %v1790_v24, 4  ;;  %v1807_v47 = vrot.slane %v1806_v40, 2  ;;  %s5532_s17 = scalar_lea.vmem %s5531_s18, 2048  ;;  %p5533_p2 = scmp.lt.s32.totalorder %s6548_s22, %s5531_s18 }
 0x2e0   : > { %v1819_v41 = vrot.slane %v1818_v37, 4  ;;  %v1786_v51 = vrot.slane %v1785_v42, 2  ;;  %p5534_p3 = scmp.lt.s32.totalorder %s5532_s17, %s5526_s30 }
 0x2e1   : > { %v1770_v6 = vpop.f32.mrb[14].mxu1  ;;  %v1792_v45 = vmax.f32 %v1790_v24, %v1791_v39  ;;  %v1808_v60 = vmax.f32 %v1806_v40, %v1807_v47 }
 0x2e2   : > { %v1420_v7 = vpop.f32.mrb[10].mxu0  ;;  %v5105_v8 = vpop.f32.mrb[15].mxu1  ;;  %v6123_v44 = vsel %vm613_vm8, %v1770_v6, -1e+25  ;;  %v1820_v48 = vmax.f32 %v1818_v37, %v1819_v41  ;;  %v1787_v62 = vmax.f32 %v1785_v42, %v1786_v51  ;;  %p5535_p4 = por %p5534_p3, %p5533_p2 }
 0x2e3   : > { %v5080_v9 = vpop.f32.mrb[11].mxu0  ;;  %v6127_v46 = vsel %vm608_vm9, %v1420_v7, -1e+25  ;;  %v1832_v50 = vsel %vm1782_vm6, %v6123_v44, -inf  ;;  %v1793_v52 = vrot.slane %v1792_v45, 2  ;;  %v1809_v2 = vrot.slane %v1808_v60, 1 }
 0x2e4   : > { %v1797_v55 = vsel %vm1782_vm6, %v6127_v46, -inf  ;;  %v1833_v59 = vrot.slane %v1832_v50, 4  ;;  %v1821_v61 = vrot.slane %v1820_v48, 2  ;;  %v1788_v5 = vrot.slane %v1787_v62, 1  ;;  %p5536_p7 = pnand %p5535_p4, %p5529_p12 }
 0x2e5   : > { %v1798_v63 = vrot.slane %v1797_v55, 4  ;;  %v1794_v0 = vmax.f32 %v1792_v45, %v1793_v52 }
 0x2e6   : > { %v1560_v10 = vpop.f32.mrb[12].mxu0  ;;  %v1834_v1 = vmax.f32 %v1832_v50, %v1833_v59  ;;  %v1822_v3 = vmax.f32 %v1820_v48, %v1821_v61  ;;  %v1789_v22 = vmax.f32 %v1787_v62, %v1788_v5 }
 0x2e7   : > { %v5090_v11 = vpop.f32.mrb[13].mxu0  ;;  %v6139_v4 = vsel %vm610_vm10, %v1560_v10, -1e+25  ;;  %v1799_v6 = vmax.f32 %v1797_v55, %v1798_v63  ;;  %v1795_v7 = vrot.slane %v1794_v0, 1 }
 0x2e8   : > { %v1835_v8 = vrot.slane %v1834_v1, 2  ;;  %v1811_v9 = vsel %vm1782_vm6, %v6139_v4, -inf  ;;  %v1810_v11 = vmax.f32 %v1808_v60, %v1809_v2  ;;  %v1839_v40 = vsub.f32 %v6094_v19, %v1789_v22 }
 0x2e9   : > { %v1800_v24 = vrot.slane %v1799_v6, 2  ;;  %v1796_v35 = vmax.f32 %v1794_v0, %v1795_v7  ;;  %v1812_v36 = vrot.slane %v1811_v9, 4 }
 0x2ea   : > { %v6064_v12 = vpop.f32.mrb[14].mxu0  ;;  %v1836_v37 = vmax.f32 %v1834_v1, %v1835_v8  ;;  %v1842_v10 = vsub.f32 %v6090_v18, %v1810_v11  ;;  %v1847_v60 = vmul.f32 1.442695, %v1839_v40 }
 0x2eb   : > { %v5100_v13 = vpop.f32.mrb[15].mxu0  ;;  %v1801_v42 = vmax.f32 %v1799_v6, %v1800_v24  ;;  %v1840_v48 = vsub.f32 %v6099_v20, %v1796_v35  ;;  %v1813_v50 = vmax.f32 %v1811_v9, %v1812_v36  ;;  %v6157_v51 = vsel %vm612_vm11, %v6064_v12, -1e+25 }
 0x2ec   : > { %v1823_v13 = vrot.slane %v1822_v3, 1  ;;  %v1837_v52 = vrot.slane %v1836_v37, 1  ;;  %v1853_v55 = vmul.f32 1.442695, %v1842_v10  ;;  %v1825_v20 = vsel %vm1782_vm6, %v6157_v51, -inf }
 0x2ed   : > { %v1802_v62 = vrot.slane %v1801_v42, 1  ;;  %v1849_v1 = vmul.f32 1.442695, %v1840_v48  ;;  %v1814_v2 = vrot.slane %v1813_v50, 2  ;;  %v1826_v8 = vrot.slane %v1825_v20, 4 }
 0x2ee   : > { %v1824_v39 = vmax.f32 %v1822_v3, %v1823_v13  ;;  %v1838_v5 = vmax.f32 %v1836_v37, %v1837_v52  ;;  %5394 = vpow2.f32 %v1853_v55 }
 0x2ef   : > { %v1803_v9 = vmax.f32 %v1801_v42, %v1802_v62  ;;  %5396 = vpow2.f32 %v1847_v60  ;;  %v6170_v24 = vmax.f32 %v1813_v50, %v1814_v2  ;;  %v1827_v42 = vmax.f32 %v1825_v20, %v1826_v8 }
 0x2f0   : > { %v1844_v59 = vsub.f32 %v6107_v23, %v1824_v39  ;;  %5398 = vpow2.f32 %v1849_v1  ;;  %v1846_v37 = vsub.f32 %v6123_v44, %v1838_v5 }
 0x2f1   : > { %v1828_v8 = vrot.slane %v1827_v42, 2 }
 0x2f2   : > { %v1857_v7 = vmul.f32 1.442695, %v1844_v59  ;;  %v1816_v59 = vrot.slane %v6170_v24, 1 }
 0x2f4   : > { %5400 = vpow2.f32 %v1857_v7 }
 0x34d   : > { %v2633_v41 = vpop.f32.mrb[16].mxu1 }
 0x34e   : > { %v6151_v45 = vsel %vm606_vm4, %v2633_v41, -1e+25  ;;  %v5150_v47 = vpop.f32.mrb[17].mxu1 }
 0x34f   : > { %v3135_v18 = vsel %vm1782_vm6, %v6151_v45, -inf }
 0x350   : > { %v3136_v19 = vrot.slane %v3135_v18, 4 }
 0x351   : > { %v2703_v61 = vpop.f32.mrb[18].mxu1 }
 0x352   : > { %v3137_v63 = vmax.f32 %v3135_v18, %v3136_v19  ;;  %v6166_v0 = vsel %vm607_vm5, %v2703_v61, -1e+25  ;;  %v5155_v12 = vpop.f32.mrb[19].mxu1  ;;  %v1841_v18 = vsub.f32 %v6127_v46, %v1803_v9 }
 0x353   : > { %v3142_v3 = vsel %vm1782_vm6, %v6166_v0, -inf }
 0x354   : > { %v3138_v6 = vrot.slane %v3137_v63, 2  ;;  %v3143_v23 = vrot.slane %v3142_v3, 4 }
 0x356   : > { %v3139_v11 = vmax.f32 %v3137_v63, %v3138_v6  ;;  %v3144_v13 = vmax.f32 %v3142_v3, %v3143_v23  ;;  %v2843_v22 = vpop.f32.mrb[20].mxu1  ;;  %v1861_v63 = vmul.f32 1.442695, %v1846_v37 }
 0x357   : > { %v6174_v35 = vsel %vm609_vm3, %v2843_v22, -1e+25  ;;  %v5165_v36 = vpop.f32.mrb[21].mxu1  ;;  %v6200_v22 = vpop.eup %5394 }
 0x358   : > { %v3140_v10 = vrot.slane %v3139_v11, 1  ;;  %v3145_v39 = vrot.slane %v3144_v13, 2  ;;  %v2773_v40 = vpop.f32.mrb[18].mxu0  ;;  %v3156_v41 = vsel %vm1782_vm6, %v6174_v35, -inf }
 0x359   : > { %v6181_v47 = vsel %vm608_vm9, %v2773_v40, -1e+25  ;;  %v3157_v48 = vrot.slane %v3156_v41, 4  ;;  %v5160_v50 = vpop.f32.mrb[19].mxu0 }
 0x35a   : > { %v3141_v52 = vmax.f32 %v3139_v11, %v3140_v10  ;;  %v3146_v19 = vmax.f32 %v3144_v13, %v3145_v39  ;;  %v3149_v44 = vsel %vm1782_vm6, %v6181_v47, -inf  ;;  %v2983_v55 = vpop.f32.mrb[22].mxu1 }
 0x35b   : > { %v3150_v60 = vrot.slane %v3149_v44, 4  ;;  %v3158_v61 = vmax.f32 %v3156_v41, %v3157_v48  ;;  %v6189_v62 = vsel %vm611_vm7, %v2983_v55, -1e+25  ;;  %v5175_v20 = vpop.f32.mrb[23].mxu1  ;;  %v6202_v41 = vpop.eup %5396  ;;  %v1851_v48 = vmul.f32 1.442695, %v1841_v18 }
 0x35c   : > { %v3191_v12 = vsub.f32 %v6151_v45, %v3141_v52  ;;  %v3147_v1 = vrot.slane %v3146_v19, 1  ;;  %v2913_v46 = vpop.f32.mrb[20].mxu0  ;;  %v3170_v2 = vsel %vm1782_vm6, %v6189_v62, -inf }
 0x35d   : > { %v3151_v3 = vmax.f32 %v3149_v44, %v3150_v60  ;;  %v3159_v5 = vrot.slane %v3158_v61, 2  ;;  %v6196_v6 = vsel %vm610_vm10, %v2913_v46, -1e+25  ;;  %v3171_v23 = vrot.slane %v3170_v2, 4  ;;  %v5170_v7 = vpop.f32.mrb[21].mxu0  ;;  %v6209_v44 = vpop.eup %5398 }
 0x35e   : > { %v3199_v9 = vmul.f32 1.442695, %v3191_v12  ;;  %v3148_v11 = vmax.f32 %v3146_v19, %v3147_v1  ;;  %v3163_v13 = vsel %vm1782_vm6, %v6196_v6, -inf  ;;  %v3123_v45 = vpop.f32.mrb[24].mxu1  ;;  %v1829_v1 = vmax.f32 %v1827_v42, %v1828_v8 }
 0x35f   : > { %v3152_v36 = vrot.slane %v3151_v3, 2  ;;  %v3160_v37 = vmax.f32 %v3158_v61, %v3159_v5  ;;  %v3164_v10 = vrot.slane %v3163_v13, 4  ;;  %v3172_v39 = vmax.f32 %v3170_v2, %v3171_v23  ;;  %v5185_v40 = vpop.f32.mrb[25].mxu1  ;;  %v6217_v2 = vpop.eup %5400 }
 0x360   : > { %5402 = vpow2.f32 %v3199_v9  ;;  %v3192_v50 = vsub.f32 %v6166_v0, %v3148_v11  ;;  %v3053_v52 = vpop.f32.mrb[22].mxu0  ;;  %v6207_v19 = vsel %vm613_vm8, %v3123_v45, -1e+25 }
 0x361   : > { %v3153_v55 = vmax.f32 %v3151_v3, %v3152_v36  ;;  %v3161_v60 = vrot.slane %v3160_v37, 1  ;;  %v3165_v20 = vmax.f32 %v3163_v13, %v3164_v10  ;;  %v3173_v61 = vrot.slane %v3172_v39, 2  ;;  %v5180_v12 = vpop.f32.mrb[23].mxu0 }
 0x362   : > { %v3201_v46 = vmul.f32 1.442695, %v3192_v50  ;;  %v6213_v18 = vsel %vm612_vm11, %v3053_v52, -1e+25  ;;  %v3184_v0 = vsel %vm1782_vm6, %v6207_v19, -inf  ;;  %v1817_v3 = vmax.f32 %v6170_v24, %v1816_v59 }
 0x363   : > { %v3154_v5 = vrot.slane %v3153_v55, 1  ;;  %v3162_v23 = vmax.f32 %v3160_v37, %v3161_v60  ;;  %v3166_v7 = vrot.slane %v3165_v20, 2  ;;  %v3174_v9 = vmax.f32 %v3172_v39, %v3173_v61 }
 0x364   : > { %5404 = vpow2.f32 %v3201_v46  ;;  %v3177_v42 = vsel %vm1782_vm6, %v6213_v18, -inf  ;;  %v3185_v8 = vrot.slane %v3184_v0, 4  ;;  %v1830_v10 = vrot.slane %v1829_v1, 1 }
 0x365   : > { %v3155_v11 = vmax.f32 %v3153_v55, %v3154_v5  ;;  %v3194_v13 = vsub.f32 %v6174_v35, %v3162_v23  ;;  %v3167_v45 = vmax.f32 %v3165_v20, %v3166_v7  ;;  %v3175_v36 = vrot.slane %v3174_v9, 1 }
 0x366   : > { %5406 = vpow2.f32 %v1861_v63  ;;  %v3178_v40 = vrot.slane %v3177_v42, 4  ;;  %v3186_v50 = vmax.f32 %v3184_v0, %v3185_v8  ;;  %v1843_v24 = vsub.f32 %v6139_v4, %v1817_v3 }
 0x367   : > { %v3193_v37 = vsub.f32 %v6181_v47, %v3155_v11  ;;  %v3205_v52 = vmul.f32 1.442695, %v3194_v13  ;;  %v3168_v39 = vrot.slane %v3167_v45, 1  ;;  %v3176_v60 = vmax.f32 %v3174_v9, %v3175_v36 }
 0x368   : > { %5408 = vpow2.f32 %v1851_v48  ;;  %v3179_v59 = vmax.f32 %v3177_v42, %v3178_v40  ;;  %v3187_v61 = vrot.slane %v3186_v50, 2  ;;  %v1884_v63 = vsel %vm1782_vm6, %v6200_v22, 0.0 }
 0x369   : > { %v3203_v12 = vmul.f32 1.442695, %v3193_v37  ;;  %5410 = vpow2.f32 %v3205_v52  ;;  %v3169_v55 = vmax.f32 %v3167_v45, %v3168_v39  ;;  %v3196_v35 = vsub.f32 %v6189_v62, %v3176_v60 }
 0x36a   : > { %v6226_v20 = vpop.eup %5402  ;;  %v1831_v46 = vmax.f32 %v1829_v1, %v1830_v10  ;;  %v3180_v47 = vrot.slane %v3179_v59, 2  ;;  %v3188_v0 = vmax.f32 %v3186_v50, %v3187_v61  ;;  %v1863_v23 = vsel %vm1782_vm6, %v6202_v41, 0.0 }
 0x36b   : > { %v3215_v48 = vsel %vm1782_vm6, %v6226_v20, 0.0  ;;  %5412 = vpow2.f32 %v3203_v12  ;;  %v3195_v4 = vsub.f32 %v6196_v6, %v3169_v55  ;;  %v3209_v5 = vmul.f32 1.442695, %v3196_v35 }
 0x36c   : > { %v3216_v7 = vrot.slane %v3215_v48, 4  ;;  %v3181_v62 = vmax.f32 %v3179_v59, %v3180_v47  ;;  %v3189_v9 = vrot.slane %v3188_v0, 1  ;;  %v1885_v3 = vrot.slane %v1884_v63, 4 }
 0x36d   : > { %v1855_v42 = vmul.f32 1.442695, %v1843_v24  ;;  %v3207_v8 = vmul.f32 1.442695, %v3195_v4  ;;  %5414 = vpow2.f32 %v3209_v5  ;;  %v1845_v36 = vsub.f32 %v6157_v51, %v1831_v46 }
 0x36e   : > { %v6235_v1 = vpop.eup %5404  ;;  %v3217_v11 = vadd.f32 %v3216_v7, %v3215_v48  ;;  %v3182_v13 = vrot.slane %v3181_v62, 1  ;;  %v3190_v45 = vmax.f32 %v3188_v0, %v3189_v9  ;;  %v1864_v10 = vrot.slane %v1863_v23, 4 }
 0x36f   : > { %v3222_v6 = vsel %vm1782_vm6, %v6235_v1, 0.0  ;;  %5416 = vpow2.f32 %v3207_v8  ;;  %v1886_v60 = vadd.f32 %v1885_v3, %v1884_v63  ;;  %v1870_v24 = vsel %vm1782_vm6, %v6209_v44, 0.0 }
 0x370   : > { %v6240_v40 = vpop.eup %5406  ;;  %v3218_v50 = vrot.slane %v3217_v11, 2  ;;  %v3223_v37 = vrot.slane %v3222_v6, 4  ;;  %v3183_v52 = vmax.f32 %v3181_v62, %v3182_v13  ;;  %v3198_v39 = vsub.f32 %v6207_v19, %v3190_v45 }
 0x371   : > { %6628 = vst [vmem:[#allocation14_spill] sm:$0xff] %v6240_v40  ;;  %5418 = vpow2.f32 %v1855_v42  ;;  %v1898_v46 = vsel %vm1782_vm6, %v6217_v2, 0.0  ;;  %v1859_v47 = vmul.f32 1.442695, %v1845_v36  ;;  %v1865_v0 = vadd.f32 %v1864_v10, %v1863_v23 }
 0x372   : > { %v6245_v59 = vpop.eup %5408  ;;  %v3219_v51 = vadd.f32 %v3218_v50, %v3217_v11  ;;  %v3224_v61 = vadd.f32 %v3223_v37, %v3222_v6  ;;  %v3197_v12 = vsub.f32 %v6213_v18, %v3183_v52  ;;  %v3213_v55 = vmul.f32 1.442695, %v3198_v39 }
 0x373   : > { %6629 = vst [vmem:[#allocation15_spill] sm:$0xff] %v6245_v59  ;;  %v6248_v35 = vpop.eup %5410  ;;  %v1887_v7 = vrot.slane %v1886_v60, 2  ;;  %v1871_v62 = vrot.slane %v1870_v24, 4  ;;  %v1899_v23 = vrot.slane %v1898_v46, 4  ;;  %v1866_v45 = vrot.slane %v1865_v0, 2 }
 0x374   : > { %v3220_v19 = vrot.slane %v3219_v51, 1  ;;  %v3225_v63 = vrot.slane %v3224_v61, 2  ;;  %v3236_v48 = vsel %vm1782_vm6, %v6248_v35, 0.0  ;;  %v3211_v4 = vmul.f32 1.442695, %v3197_v12 }
 0x375   : > { %v6254_v5 = vpop.eup %5412  ;;  %v3237_v9 = vrot.slane %v3236_v48, 4  ;;  %5420 = vpow2.f32 %v3213_v55  ;;  %v1912_v50 = vsel %vm1782_vm6, %v6240_v40, 0.0  ;;  %v1867_v31 = vadd.f32 %v1866_v45, %v1865_v0 }
 0x376   : > { %v3221_v18 = vadd.f32 %v3220_v19, %v3219_v51  ;;  %v3226_v3 = vadd.f32 %v3225_v63, %v3224_v61  ;;  %v3229_v42 = vsel %vm1782_vm6, %v6254_v5, 0.0  ;;  %5422 = vpow2.f32 %v3211_v4 }
 0x377   : > { %v6258_v8 = vpop.eup %5414  ;;  %5424 = vpow2.f32 %v1859_v47  ;;  %v3230_v11 = vrot.slane %v3229_v42, 4  ;;  %v3238_v13 = vadd.f32 %v3237_v9, %v3236_v48  ;;  %v6266_v51 = vadd.f32 %v1887_v7, %v1886_v60 }
 0x378   : > { %5426 = vrcp.f32 %v3221_v18  ;;  %v3227_v36 = vrot.slane %v3226_v3, 1  ;;  %v3250_v10 = vsel %vm1782_vm6, %v6258_v8, 0.0  ;;  %v1877_v61 = vsel %vm1782_vm6, %v6245_v59, 0.0 }
 0x379   : > { %v6262_v6 = vpop.eup %5416  ;;  %v3231_v37 = vadd.f32 %v3230_v11, %v3229_v42  ;;  %v3239_v52 = vrot.slane %v3238_v13, 2  ;;  %v3251_v39 = vrot.slane %v3250_v10, 4  ;;  %v1872_v9 = vadd.f32 %v1871_v62, %v1870_v24 }
 0x37a   : > { %v3228_v12 = vadd.f32 %v3227_v36, %v3226_v3  ;;  %v3243_v55 = vsel %vm1782_vm6, %v6262_v6, 0.0  ;;  %v1900_v18 = vadd.f32 %v1899_v23, %v1898_v46  ;;  %v1913_v42 = vrot.slane %v1912_v50, 4 }
 0x37b   : > { %v6272_v47 = vpop.eup %5418  ;;  %v3232_v19 = vrot.slane %v3231_v37, 2  ;;  %v3240_v63 = vadd.f32 %v3239_v52, %v3238_v13  ;;  %v3244_v48 = vrot.slane %v3243_v55, 4  ;;  %v3252_v4 = vadd.f32 %v3251_v39, %v3250_v10 }
 0x37c   : > { %6630 = vst [vmem:[#allocation16_spill] sm:$0xff] %v6272_v47  ;;  %5428 = vrcp.f32 %v3228_v12  ;;  %v1889_v33 = vrot.slane %v6266_v51, 1  ;;  %v1878_v3 = vrot.slane %v1877_v61, 4  ;;  %v1891_v36 = vsel %vm1782_vm6, %v6272_v47, 0.0 }
 0x37d   : > { %v3233_v11 = vadd.f32 %v3232_v19, %v3231_v37  ;;  %v3241_v60 = vrot.slane %v3240_v63, 1  ;;  %v3245_v7 = vadd.f32 %v3244_v48, %v3243_v55  ;;  %v3253_v34 = vrot.slane %v3252_v4, 2 }
 0x37e   : > { %v1873_v62 = vrot.slane %v1872_v9, 2  ;;  %v1901_v23 = vrot.slane %v1900_v18, 2  ;;  %v1914_v37 = vadd.f32 %v1913_v42, %v1912_v50  ;;  %v1879_v48 = vadd.f32 %v1878_v3, %v1877_v61 }
 0x37f   : > { %v6277_v29 = vpop.eup %5420  ;;  %v3234_v13 = vrot.slane %v3233_v11, 1  ;;  %v3242_v52 = vadd.f32 %v3241_v60, %v3240_v63  ;;  %v3246_v10 = vrot.slane %v3245_v7, 2  ;;  %v3254_v24 = vadd.f32 %v3253_v34, %v3252_v4 }
 0x380   : > { %v6279_v46 = vpop.eup %5422  ;;  %v3264_v39 = vsel %vm1782_vm6, %v6277_v29, 0.0  ;;  %v1892_v47 = vrot.slane %v1891_v36, 4  ;;  %v1902_v60 = vadd.f32 %v1901_v23, %v1900_v18  ;;  %v1915_v32 = vrot.slane %v1914_v37, 2 }
 0x381   : > { %v6283_v12 = vpop.eup %5424  ;;  %v3235_v55 = vadd.f32 %v3234_v13, %v3233_v11  ;;  %5430 = vrcp.f32 %v3242_v52  ;;  %v3247_v19 = vadd.f32 %v3246_v10, %v3245_v7  ;;  %v3255_v0 = vrot.slane %v3254_v24, 1 }
 0x382   : > { %v5427_v45 = vpop.eup %5426  ;;  %v3257_v34 = vsel %vm1782_vm6, %v6279_v46, 0.0  ;;  %v3265_v63 = vrot.slane %v3264_v39, 4  ;;  %v1905_v11 = vsel %vm1782_vm6, %v6283_v12, 0.0  ;;  %v1874_v13 = vadd.f32 %v1873_v62, %v1872_v9 }
 0x383   : > { %v3279_v4 = vmul.f32 %v5427_v45, %v6226_v20  ;;  %5432 = vrcp.f32 %v3235_v55  ;;  %v3248_v50 = vrot.slane %v3247_v19, 1  ;;  %v3256_v42 = vadd.f32 %v3255_v0, %v3254_v24 }
 0x384   : > { %v3258_v59 = vrot.slane %v3257_v34, 4  ;;  %v3266_v26 = vadd.f32 %v3265_v63, %v3264_v39  ;;  %v1868_v52 = vrot.slane %v1867_v31, 1  ;;  %v1880_v20 = vrot.slane %v1879_v48, 2 }
 0x385   : > { %v3287_v7 = vmul.f32 %v3279_v4, %v6077_v15  ;;  %v3249_v61 = vadd.f32 %v3248_v50, %v3247_v19  ;;  %5434 = vrcp.f32 %v3256_v42  ;;  %v1893_v55 = vadd.f32 %v1892_v47, %v1891_v36 }
 0x386   : > { %v5429_v3 = vpop.eup %5428  ;;  %v3259_v10 = vadd.f32 %v3258_v59, %v3257_v34  ;;  %v3267_v40 = vrot.slane %v3266_v26, 2  ;;  %v1906_v18 = vrot.slane %v1905_v11, 4  ;;  %v6631_v0 = vmov 0.0  }
 0x387   : > { %v3280_v24 = vmul.f32 %v5429_v3, %v6235_v1  ;;  %5436 = vrcp.f32 %v3249_v61  ;;  %5189 = vmatmul.mubr.msk.f32.vlgmr.msra.gmra.mrb[24].mxu0 %vm1782_vm6, %v3287_v7  ;;  %v1890_v9 = vadd.f32 %v1889_v33, %v6266_v51  ;;  %v1903_v62 = vrot.slane %v1902_v60, 1 }
 0x388   : > { %v3260_v23 = vrot.slane %v3259_v10, 2  ;;  %v3268_v39 = vadd.f32 %v3267_v40, %v3266_v26  ;;  %5192 = vmatpush3.msra.mxu0 %v5948_v43  ;;  %5193 = vmatprep.mubr.msk.f32.mxu0 %vm5599_vm2, %v6631_v0  ;;  %v1916_v59 = vadd.f32 %v1915_v32, %v1914_v37  ;;  %v1875_v45 = vrot.slane %v1874_v13, 1 }
 0x389   : > { %5196 = vmatprep.subr.mxu0 %v6631_v0  ;;  %v3288_v47 = vmul.f32 %v3280_v24, %v6080_v16  ;;  %v1881_v34 = vadd.f32 %v1880_v20, %v1879_v48  ;;  %v1894_v63 = vrot.slane %v1893_v55, 2  ;;  %v1869_v26 = vadd.f32 %v1868_v52, %v1867_v31 }
 0x38a   : > { %v3261_v1 = vadd.f32 %v3260_v23, %v3259_v10  ;;  %v3269_v36 = vrot.slane %v3268_v39, 1  ;;  %v1907_v43 = vadd.f32 %v1906_v18, %v1905_v11  ;;  %5438 = vrcp.f32 %v1890_v9 }
 0x38b   : > { %v5431_v19 = vpop.eup %5430  ;;  %5194 = vmatmul.mubr.msk.f32.vlgmr.msra.gmra.mrb[26].mxu0 %vm1782_vm6, %v3288_v47  ;;  %v1904_v51 = vadd.f32 %v1903_v62, %v1902_v60  ;;  %v1917_v37 = vrot.slane %v1916_v59, 1  ;;  %v1876_v42 = vadd.f32 %v1875_v45, %v1874_v13  ;;  %v1882_v11 = vrot.slane %v1881_v34, 1  ;;  %v6634_v45 = vld [vmem:[#allocation15_spill] sm:$0xff] }
 0x38c   : > { %v3282_v40 = vmul.f32 %v5431_v19, %v6248_v35  ;;  %v3262_v4 = vrot.slane %v3261_v1, 1  ;;  %v3270_v33 = vadd.f32 %v3269_v36, %v3268_v39  ;;  %5197 = vmatpush3.msra.mxu0 %v5980_v53  ;;  %5198 = vmatprep.mubr.msk.f32.mxu0 %vm5599_vm2, %v6631_v0  ;;  %v1895_v7 = vadd.f32 %v1894_v63, %v1893_v55 }
 0x38d   : > { %v5433_v32 = vpop.eup %5432  ;;  %5206 = vmatprep.subr.mxu0 %v6631_v0  ;;  %v1908_v53 = vrot.slane %v1907_v43, 2 }
 0x38e   : > { %v3281_v31 = vmul.f32 %v5433_v32, %v6254_v5  ;;  %v3263_v48 = vadd.f32 %v3262_v4, %v3261_v1  ;;  %5440 = vrcp.f32 %v3270_v33  ;;  %v3290_v50 = vmul.f32 %v3282_v40, %v6074_v14  ;;  %v6638_v33 = vld [vmem:[#allocation11_spill] sm:$0xff] }
 0x38f   : > { %v5435_v35 = vpop.eup %5434  ;;  %5442 = vrcp.f32 %v1869_v26  ;;  %v1918_v5 = vadd.f32 %v1917_v37, %v1916_v59  ;;  %v1896_v52 = vrot.slane %v1895_v7, 1  ;;  %v1909_v10 = vadd.f32 %v1908_v53, %v1907_v43  ;;  %v6636_v26 = vld [vmem:[#allocation10_spill] sm:$0xff]  ;;  %v6637_v43 = vld [vmem:[#allocation16_spill] sm:$0xff] }
 0x390   : > { %v3284_v61 = vmul.f32 %v5435_v35, %v6258_v8  ;;  %5444 = vrcp.f32 %v3263_v48  ;;  %v3289_v60 = vmul.f32 %v3281_v31, %v6117_v38  ;;  %5204 = vmatmul.mubr.msk.f32.vlgmr.msra.gmra.mrb[26].mxu1 %vm1782_vm6, %v3290_v50 }
 0x391   : > { %v5437_v3 = vpop.eup %5436  ;;  %5212 = vmatpush3.msra.mxu1 %v5962_v49  ;;  %5213 = vmatprep.mubr.msk.f32.mxu1 %vm5599_vm2, %v6631_v0  ;;  %5446 = vrcp.f32 %v1904_v51  ;;  %v1883_v49 = vadd.f32 %v1882_v11, %v1881_v34  ;;  %v1897_v55 = vadd.f32 %v1896_v52, %v1895_v7  ;;  %v1910_v24 = vrot.slane %v1909_v10, 1  ;;  %v6635_v34 = vld [vmem:[#allocation12_spill] sm:$0xff]  ;;  %v6408_v11 = vld [vmem:[%s5738_s14] sm:$0xff] }
 0x392   : > { %v3283_v13 = vmul.f32 %v5437_v3, %v6262_v6  ;;  %5199 = vmatmul.mubr.msk.f32.vlgmr.msra.gmra.mrb[28].mxu0 %vm1782_vm6, %v3289_v60  ;;  %5221 = vmatprep.subr.mxu1 %v6631_v0  ;;  %v3292_v8 = vmul.f32 %v3284_v61, %v6085_v17  ;;  %5448 = vrcp.f32 %v1876_v42 }
 0x393   : > { %5207 = vmatpush3.msra.mxu0 %v6000_v56  ;;  %5208 = vmatprep.mubr.msk.f32.mxu0 %vm5599_vm2, %v6631_v0  ;;  %5450 = vrcp.f32 %v1918_v5  ;;  %v1911_v59 = vadd.f32 %v1910_v24, %v1909_v10 }
 0x394   : > { %5216 = vmatprep.subr.mxu0 %v6631_v0  ;;  %v3291_v20 = vmul.f32 %v3283_v13, %v6134_v57  ;;  %5214 = vmatmul.mubr.msk.f32.vlgmr.msra.gmra.mrb[28].mxu1 %vm1782_vm6, %v3292_v8  ;;  %v5439_v56 = vpop.eup %5438  ;;  %5452 = vrcp.f32 %v1883_v49  ;;  %v6419_v13 = vld [vmem:[%s5738_s14 + $0x18] sm:$0xff] }
 0x395   : > { %5222 = vmatpush3.msra.mxu1 %v5985_v54  ;;  %5223 = vmatprep.mubr.msk.f32.mxu1 %vm5599_vm2, %v6631_v0  ;;  %v1930_v39 = vmul.f32 %v5439_v56, %v6200_v22  ;;  %5454 = vrcp.f32 %v1897_v55 }
 0x396   : > { %5209 = vmatmul.mubr.msk.f32.vlgmr.msra.gmra.mrb[30].mxu0 %vm1782_vm6, %v3291_v20  ;;  %5241 = vmatprep.subr.mxu1 %v6631_v0  ;;  %5456 = vrcp.f32 %v1911_v59 }
 0x397   : > { %5217 = vmatpush3.msra.mxu0 %v6018_v58  ;;  %5218 = vmatprep.mubr.msk.f32.mxu0 %vm5599_vm2, %v6631_v0 }
 0x398   : > { %v5441_v6 = vpop.eup %5440  ;;  %5226 = vmatprep.subr.mxu0 %v6631_v0 }
 0x399   : > { %v5443_v54 = vpop.eup %5442  ;;  %v3286_v18 = vmul.f32 %v5441_v6, %v6277_v29  ;;  %v1938_v29 = vmul.f32 %v1930_v39, %v6074_v14 }
 0x39a   : > { %v5445_v23 = vpop.eup %5444  ;;  %v1927_v1 = vmul.f32 %v5443_v54, %v6202_v41  ;;  %v6431_v54 = vld [vmem:[%s5738_s14 + $0x8] sm:$0xff] }
 0x39b   : > { %v3285_v9 = vmul.f32 %v5445_v23, %v6279_v46  ;;  %v3294_v62 = vmul.f32 %v3286_v18, %v6112_v25  ;;  %v5447_v58 = vpop.eup %5446 }
 0x39c   : > { %v5449_v47 = vpop.eup %5448  ;;  %v1932_v22 = vmul.f32 %v5447_v58, %v6217_v2  ;;  %v1935_v41 = vmul.f32 %v1927_v1, %v6077_v15 }
 0x39d   : > { %v3293_v36 = vmul.f32 %v3285_v9, %v6144_v21  ;;  %5224 = vmatmul.mubr.msk.f32.vlgmr.msra.gmra.mrb[30].mxu1 %vm1782_vm6, %v3294_v62  ;;  %v5451_v46 = vpop.eup %5450  ;;  %v6438_v62 = vld [vmem:[%s5738_s14 + $0x28] sm:$0xff] }
 0x39e   : > { %5242 = vmatpush3.msra.mxu1 %v5792_v28  ;;  %5243 = vmatprep.mubr.msk.f32.mxu1 %vm5599_vm2, %v6631_v0  ;;  %v1928_v28 = vmul.f32 %v5449_v47, %v6209_v44  ;;  %v5453_v14 = vpop.eup %5452  ;;  %v1940_v2 = vmul.f32 %v1932_v22, %v6085_v17  ;;  %v6633_v44 = vld [vmem:[#allocation9_spill] sm:$0xff] }
 0x39f   : > { %5219 = vmatmul.mubr.msk.f32.vlgmr.msra.gmra.mrb[32].mxu0 %vm1782_vm6, %v3293_v36  ;;  %5251 = vmatprep.subr.mxu1 %v6631_v0  ;;  %v5455_v17 = vpop.eup %5454 }
 0x3a0   : > { %5227 = vmatpush3.msra.mxu0 %v5784_v27  ;;  %5228 = vmatprep.mubr.msk.f32.mxu0 %vm5599_vm2, %v6631_v0  ;;  %v6632_v27 = vld [vmem:[#allocation14_spill] sm:$0xff]  ;;  %v1936_v15 = vmul.f32 %v1928_v28, %v6080_v16  ;;  %v1931_v40 = vmul.f32 %v5455_v17, %v6637_v43  ;;  %v5457_v4 = vpop.eup %5456  ;;  %v6475_v43 = vld [vmem:[%s5738_s14 + $0x38] sm:$0xff] }
 0x3a1   : > { %5231 = vmatprep.subr.mxu0 %v6631_v0  ;;  %5244 = vmatmul.mubr.msk.f32.vlgmr.msra.gmra.mrb[26].mxu1 %vm1782_vm6, %v1938_v29  ;;  %v1934_v19 = vmul.f32 %v5451_v46, %v6632_v27  ;;  %v1933_v32 = vmul.f32 %v5457_v4, %v6283_v12  ;;  %v6397_v12 = vld [vmem:[%s6599_s4] ss:$0 sm:$0xff] }
 0x3a2   : > { %5252 = vmatpush3.msra.mxu1 %v5800_v30  ;;  %5253 = vmatprep.mubr.msk.f32.mxu1 %vm5599_vm2, %v6631_v0  ;;  %v1929_v30 = vmul.f32 %v5453_v14, %v6634_v45  ;;  %v4496_v7 = vmul.f32 %v6408_v11, %v6397_v12  ;;  %v4499_v8 = vmul.f32 %v6419_v13, %v6397_v12 }
 0x3a3   : > { %5229 = vmatmul.mubr.msk.f32.vlgmr.msra.gmra.mrb[24].mxu0 %vm1782_vm6, %v1935_v41  ;;  %5261 = vmatprep.subr.mxu1 %v6631_v0  ;;  %v1942_v63 = vmul.f32 %v1934_v19, %v6112_v25  ;;  %v1939_v25 = vmul.f32 %v1931_v40, %v6134_v57  ;;  %v1941_v51 = vmul.f32 %v1933_v32, %v6144_v21 }
 0x3a4   : > { %5232 = vmatpush3.msra.mxu0 %v6633_v44  ;;  %5233 = vmatprep.mubr.msk.f32.mxu0 %vm5599_vm2, %v6631_v0  ;;  %v1937_v16 = vmul.f32 %v1929_v30, %v6117_v38  ;;  %v6639_v38 = vld [vmem:[#allocation13_spill] sm:$0xff]  ;;  %v4497_v18 = vmul.f32 %v6431_v54, %v6397_v12  ;;  %v4501_v58 = vmul.f32 %v6438_v62, %v6397_v12 }
 0x3a5   : > { %5236 = vmatprep.subr.mxu0 %v6631_v0  ;;  %5254 = vmatmul.mubr.msk.f32.vlgmr.msra.gmra.mrb[28].mxu1 %vm1782_vm6, %v1940_v2  ;;  %v6455_v2 = vld [vmem:[%s5738_s14 + $0x10] sm:$0xff]  ;;  %v4503_v40 = vmul.f32 %v6475_v43, %v6397_v12 }
 0x3a6   : > { %5262 = vmatpush3.msra.mxu1 %v6635_v34  ;;  %5263 = vmatprep.mubr.msk.f32.mxu1 %vm5599_vm2, %v6631_v0  ;;  %v4498_v27 = vmul.f32 %v6455_v2, %v6397_v12  ;;  %v6467_v34 = vld [vmem:[%s5738_s14 + $0x20] sm:$0xff] }
 0x3a7   : > { %5234 = vmatmul.mubr.msk.f32.vlgmr.msra.gmra.mrb[26].mxu0 %vm1782_vm6, %v1936_v15 }
 0x3a8   : > { %5237 = vmatpush3.msra.mxu0 %v6636_v26  ;;  %5238 = vmatprep.mubr.msk.f32.mxu0 %vm5599_vm2, %v6631_v0 }
 0x3a9   : > { %5246 = vmatprep.subr.mxu0 %v6631_v0  ;;  %5264 = vmatmul.mubr.msk.f32.vlgmr.msra.gmra.mrb[30].mxu1 %vm1782_vm6, %v1942_v63  ;;  %v4500_v63 = vmul.f32 %v6467_v34, %v6397_v12 }
 0x3ab   : > { %5239 = vmatmul.mubr.msk.f32.vlgmr.msra.gmra.mrb[28].mxu0 %vm1782_vm6, %v1937_v16 }
 0x3ac   : > { %5247 = vmatpush3.msra.mxu0 %v6638_v33  ;;  %5248 = vmatprep.mubr.msk.f32.mxu0 %vm5599_vm2, %v6631_v0 }
 0x3ad   : > { %5256 = vmatprep.subr.mxu0 %v6631_v0 }
 0x3af   : > { %5249 = vmatmul.mubr.msk.f32.vlgmr.msra.gmra.mrb[30].mxu0 %vm1782_vm6, %v1939_v25 }
 0x3b0   : > { %5257 = vmatpush3.msra.mxu0 %v6639_v38  ;;  %5258 = vmatprep.mubr.msk.f32.mxu0 %vm5599_vm2, %v6631_v0  ;;  %v6404_v0 = vld [vmem:[%s6600_s5] ss:$0 sm:$0xff] }
 0x3b3   : > { %5259 = vmatmul.mubr.msk.f32.vlgmr.msra.gmra.mrb[32].mxu0 %vm1782_vm6, %v1941_v51 }
 0x474   : > { %v4175_v37 = vpop.f32.mrb[26].mxu1 }
 0x475   : > { %v6392_v31 = vmul.f32 0.5, %v4175_v37  ;;  %v5245_v57 = vpop.f32.mrb[27].mxu1 }
 0x476   : > { %v3956_v48 = vpop.f32.mrb[24].mxu0  ;;  %v6487_v57 = vld [vmem:[%s5738_s14 + $0x30] sm:$0xff]  ;;  %s4489_s14 = sld [smem:[#allocation2]] }
 0x477   : > { %v6399_v50 = vmul.f32 0.5, %v3956_v48  ;;  %v4482_v21 = vmax.f32 %v6392_v31, 0.0  ;;  %v5230_v35 = vpop.f32.mrb[25].mxu0  ;;  %v4502_v48 = vmul.f32 %v6487_v57, %v6397_v12 }
 0x478   : > { %v4321_v42 = vpop.f32.mrb[28].mxu1 }
 0x479   : > { %v4479_v53 = vmax.f32 %v6399_v50, 0.0  ;;  %v6413_v61 = vmul.f32 0.5, %v4321_v42  ;;  %v5255_v60 = vpop.f32.mrb[29].mxu1  ;;  %v4513_v3 = vmul.f32 %v6404_v0, %v4482_v21 }
 0x47a   : > { %v4029_v5 = vpop.f32.mrb[26].mxu0 }
 0x47b   : > { %v4510_v49 = vmul.f32 %v6404_v0, %v4479_v53  ;;  %v6426_v52 = vmul.f32 0.5, %v4029_v5  ;;  %v4484_v10 = vmax.f32 %v6413_v61, 0.0  ;;  %v5235_v20 = vpop.f32.mrb[27].mxu0  ;;  %v4521_v9 = vadd.f32 %v4513_v3, %v4499_v8 }
 0x47c   : > { %v4467_v56 = vpop.f32.mrb[30].mxu1  ;;  %v4550_v12 = vstv %s4489_s14 }
 0x47d   : > { %v4480_v6 = vmax.f32 %v6426_v52, 0.0  ;;  %v5265_v55 = vpop.f32.mrb[31].mxu1  ;;  %v4518_v24 = vadd.f32 %v4510_v49, %v4496_v7  ;;  %v6435_v39 = vmul.f32 0.5, %v4467_v56  ;;  %v4515_v47 = vmul.f32 %v6404_v0, %v4484_v10 }
 0x47e   : > { %v4102_v23 = vpop.f32.mrb[28].mxu0  ;;  %v4535_v14 = vsel %vm338_vm0, %v4521_v9, 0.0 }
 0x47f   : > { %v4511_v59 = vmul.f32 %v6404_v0, %v4480_v6  ;;  %v6448_v1 = vmul.f32 0.5, %v4102_v23  ;;  %v5240_v36 = vpop.f32.mrb[29].mxu0  ;;  %v4526_v29 = vsel %vm338_vm0, %v4518_v24, 0.0  ;;  %v4486_v28 = vmax.f32 %v6435_v39, 0.0 }
 0x480   : > { %4527 = vadd.xlane.f32.xlu0 %v4526_v29  ;;  %v4523_v30 = vadd.f32 %v4515_v47, %v4501_v58 }
 0x481   : > { %v4481_v22 = vmax.f32 %v6448_v1, 0.0  ;;  %v4519_v46 = vadd.f32 %v4511_v59, %v4497_v18  ;;  %v4517_v26 = vmul.f32 %v6404_v0, %v4486_v28 }
 0x482   : > { %v4248_v41 = vpop.f32.mrb[30].mxu0  ;;  %v4541_v32 = vsel %vm338_vm0, %v4523_v30, 0.0 }
 0x483   : > { %v4512_v19 = vmul.f32 %v6404_v0, %v4481_v22  ;;  %v6462_v44 = vmul.f32 0.5, %v4248_v41  ;;  %v5250_v15 = vpop.f32.mrb[31].mxu0  ;;  %v4529_v45 = vsel %vm338_vm0, %v4519_v46, 0.0  ;;  %v4525_v60 = vadd.f32 %v4517_v26, %v4503_v40 }
 0x484   : > { %4530 = vadd.xlane.f32.xlu1 %v4529_v45  ;;  %4536 = vadd.xlane.f32.xlu0 %v4535_v14 }
 0x485   : > { %v4483_v17 = vmax.f32 %v6462_v44, 0.0  ;;  %v4520_v38 = vadd.f32 %v4512_v19, %v4498_v27  ;;  %v4547_v8 = vsel %vm338_vm0, %v4525_v60, 0.0 }
 0x486   : > { %v4394_v16 = vpop.f32.mrb[32].mxu0 }
 0x487   : > { %v4514_v4 = vmul.f32 %v6404_v0, %v4483_v17  ;;  %v6482_v33 = vmul.f32 0.5, %v4394_v16  ;;  %v5260_v25 = vpop.f32.mrb[33].mxu0  ;;  %v4532_v7 = vsel %vm338_vm0, %v4520_v38, 0.0 }
 0x488   : > { %4542 = vadd.xlane.f32.xlu0 %v4541_v32 }
 0x489   : > { %v4485_v51 = vmax.f32 %v6482_v33, 0.0  ;;  %v4522_v37 = vadd.f32 %v4514_v4, %v4500_v63 }
 0x48b   : > { %v4516_v35 = vmul.f32 %v6404_v0, %v4485_v51  ;;  %v4538_v42 = vsel %vm338_vm0, %v4522_v37, 0.0 }
 0x48c   : > { %4539 = vadd.xlane.f32.xlu1 %v4538_v42  ;;  %4533 = vadd.xlane.f32.xlu0 %v4532_v7 }
 0x48d   : > { %v4524_v3 = vadd.f32 %v4516_v35, %v4502_v48 }
 0x48f   : > { %v4544_v5 = vsel %vm338_vm0, %v4524_v3, 0.0 }
 0x490   : > { %4545 = vadd.xlane.f32.xlu1 %v4544_v5  ;;  %4548 = vadd.xlane.f32.xlu0 %v4547_v8 }
 0x50d   : > { %v4528_v49 = vpop.xlane.xlu0 %4527 }
 0x50e   : > { %v4551_v20 = vadd.f32 %v4550_v12, %v4528_v49 }
 0x510   : > { %v4559_v56 = vsub.f32 0.0, %v4551_v20 }
 0x511   : > { %v4531_v0 = vpop.xlane.xlu1 %4530  ;;  %v4537_v55 = vpop.xlane.xlu0 %4536 }
 0x512   : > { %v4567_v24 = vmul.f32 1.442695, %v4559_v56  ;;  %v4552_v18 = vadd.f32 %v4550_v12, %v4531_v0  ;;  %v4554_v23 = vadd.f32 %v4550_v12, %v4537_v55 }
 0x514   : > { %5458 = vpow2.f32 %v4567_v24  ;;  %v4560_v9 = vsub.f32 0.0, %v4552_v18  ;;  %v4562_v58 = vsub.f32 0.0, %v4554_v23 }
 0x515   : > { %v4543_v59 = vpop.xlane.xlu0 %4542 }
 0x516   : > { %v4569_v47 = vmul.f32 1.442695, %v4560_v9  ;;  %v4573_v36 = vmul.f32 1.442695, %v4562_v58  ;;  %v4556_v29 = vadd.f32 %v4550_v12, %v4543_v59 }
 0x518   : > { %5460 = vpow2.f32 %v4569_v47  ;;  %v4564_v46 = vsub.f32 0.0, %v4556_v29 }
 0x519   : > { %5462 = vpow2.f32 %v4573_v36  ;;  %v4540_v41 = vpop.xlane.xlu1 %4539  ;;  %v4534_v14 = vpop.xlane.xlu0 %4533 }
 0x51a   : > { %v4577_v27 = vmul.f32 1.442695, %v4564_v46  ;;  %v4555_v19 = vadd.f32 %v4550_v12, %v4540_v41  ;;  %v4553_v15 = vadd.f32 %v4550_v12, %v4534_v14 }
 0x51c   : > { %5464 = vpow2.f32 %v4577_v27  ;;  %v4563_v45 = vsub.f32 0.0, %v4555_v19  ;;  %v4561_v30 = vsub.f32 0.0, %v4553_v15 }
 0x51d   : > { %v4546_v63 = vpop.xlane.xlu1 %4545  ;;  %v4549_v26 = vpop.xlane.xlu0 %4548 }
 0x51e   : > { %v5459_v16 = vpop.eup %5458  ;;  %v4575_v40 = vmul.f32 1.442695, %v4563_v45  ;;  %v4571_v4 = vmul.f32 1.442695, %v4561_v30  ;;  %v4557_v25 = vadd.f32 %v4550_v12, %v4546_v63  ;;  %v4558_v32 = vadd.f32 %v4550_v12, %v4549_v26 }
 0x51f   : > { %v4583_v38 = vadd.f32 1.0, %v5459_v16 }
 0x520   : > { %5466 = vpow2.f32 %v4575_v40  ;;  %v4565_v37 = vsub.f32 0.0, %v4557_v25  ;;  %v4566_v48 = vsub.f32 0.0, %v4558_v32 }
 0x521   : > { %5468 = vrcp.f32 %v4583_v38 }
 0x522   : > { %v5461_v35 = vpop.eup %5460  ;;  %5470 = vpow2.f32 %v4571_v4  ;;  %v4579_v42 = vmul.f32 1.442695, %v4565_v37  ;;  %v4581_v3 = vmul.f32 1.442695, %v4566_v48 }
 0x523   : > { %v5463_v7 = vpop.eup %5462  ;;  %v4584_v60 = vadd.f32 1.0, %v5461_v35 }
 0x524   : > { %v4586_v5 = vadd.f32 1.0, %v5463_v7  ;;  %5472 = vpow2.f32 %v4579_v42 }
 0x525   : > { %5474 = vrcp.f32 %v4584_v60 }
 0x526   : > { %v5465_v8 = vpop.eup %5464  ;;  %5476 = vrcp.f32 %v4586_v5 }
 0x527   : > { %v4588_v49 = vadd.f32 1.0, %v5465_v8  ;;  %5478 = vpow2.f32 %v4581_v3 }
 0x529   : > { %5480 = vrcp.f32 %v4588_v49 }
 0x52a   : > { %v5467_v12 = vpop.eup %5466 }
 0x52b   : > { %v5469_v20 = vpop.eup %5468  ;;  %v4587_v56 = vadd.f32 1.0, %v5467_v12 }
 0x52c   : > { %v5471_v0 = vpop.eup %5470  ;;  %v4607_v55 = vsub.f32 1.0, %v5469_v20  ;;  %v4599_v23 = vmul.f32 %v6408_v11, %v5469_v20 }
 0x52d   : > { %5482 = vrcp.f32 %v4587_v56  ;;  %v4585_v24 = vadd.f32 1.0, %v5471_v0 }
 0x52e   : > { %v5473_v18 = vpop.eup %5472  ;;  %v4615_v9 = vmul.f32 %v4607_v55, %v4479_v53 }
 0x52f   : > { %v5475_v58 = vpop.eup %5474  ;;  %5484 = vrcp.f32 %v4585_v24  ;;  %v4589_v59 = vadd.f32 1.0, %v5473_v18 }
 0x530   : > { %v5477_v47 = vpop.eup %5476  ;;  %v4623_v36 = vadd.f32 %v4615_v9, %v4599_v23  ;;  %v4608_v29 = vsub.f32 1.0, %v5475_v58  ;;  %v4600_v11 = vmul.f32 %v6431_v54, %v5475_v58 }
 0x531   : > { %v5479_v46 = vpop.eup %5478  ;;  %v4610_v41 = vsub.f32 1.0, %v5477_v47  ;;  %5486 = vrcp.f32 %v4589_v59  ;;  %v4602_v27 = vmul.f32 %v6419_v13, %v5477_v47 }
 0x532   : > { %4631 = vst.msk [vmem:[%s6504_s20] sm:$0xff] %vm338_vm0, %v4623_v36  ;;  %v4616_v50 = vmul.f32 %v4608_v29, %v4480_v6  ;;  %v4590_v53 = vadd.f32 1.0, %v5479_v46 }
 0x533   : > { %v5481_v14 = vpop.eup %5480  ;;  %v4618_v19 = vmul.f32 %v4610_v41, %v4482_v21 }
 0x534   : > { %v4624_v15 = vadd.f32 %v4616_v50, %v4600_v11  ;;  %v4612_v45 = vsub.f32 1.0, %v5481_v14  ;;  %5488 = vrcp.f32 %v4590_v53  ;;  %v4604_v63 = vmul.f32 %v6438_v62, %v5481_v14 }
 0x535   : > { %v4626_v30 = vadd.f32 %v4618_v19, %v4602_v27 }
 0x536   : > { %4632 = vst.msk [vmem:[%s6504_s20 + $0x8] sm:$0xff] %vm338_vm0, %v4624_v15  ;;  %v4620_v52 = vmul.f32 %v4612_v45, %v4484_v10 }
 0x537   : > { %v5483_v6 = vpop.eup %5482  ;;  %4634 = vst.msk [vmem:[%s6504_s20 + $0x18] sm:$0xff] %vm338_vm0, %v4626_v30 }
 0x538   : > { %v4628_v54 = vadd.f32 %v4620_v52, %v4604_v63  ;;  %v4611_v13 = vsub.f32 1.0, %v5483_v6  ;;  %v4603_v31 = vmul.f32 %v6467_v34, %v5483_v6 }
 0x539   : > { %v5485_v26 = vpop.eup %5484 }
 0x53a   : > { %4636 = vst.msk [vmem:[%s6504_s20 + $0x28] sm:$0xff] %vm338_vm0, %v4628_v54  ;;  %v4619_v21 = vmul.f32 %v4611_v13, %v4483_v17  ;;  %v4609_v62 = vsub.f32 1.0, %v5485_v26  ;;  %v4601_v16 = vmul.f32 %v6455_v2, %v5485_v26 }
 0x53b   : > { %v5487_v61 = vpop.eup %5486 }
 0x53c   : > { %v4627_v10 = vadd.f32 %v4619_v21, %v4603_v31  ;;  %v4617_v40 = vmul.f32 %v4609_v62, %v4481_v22  ;;  %v4613_v4 = vsub.f32 1.0, %v5487_v61  ;;  %v4605_v44 = vmul.f32 %v6487_v57, %v5487_v61 }
 0x53e   : > { %v5489_v25 = vpop.eup %5488  ;;  %4635 = vst.msk [vmem:[%s6504_s20 + $0x20] sm:$0xff] %vm338_vm0, %v4627_v10  ;;  %v4625_v34 = vadd.f32 %v4617_v40, %v4601_v16  ;;  %v4621_v17 = vmul.f32 %v4613_v4, %v4485_v51 }
 0x53f   : > { %v4614_v32 = vsub.f32 1.0, %v5489_v25  ;;  %v4606_v22 = vmul.f32 %v6475_v43, %v5489_v25 }
 0x540   : > { %4633 = vst.msk [vmem:[%s6504_s20 + $0x10] sm:$0xff] %vm338_vm0, %v4625_v34  ;;  %v4629_v1 = vadd.f32 %v4621_v17, %v4605_v44 }
 0x541   : > { %v4622_v2 = vmul.f32 %v4614_v32, %v4486_v28 }
 0x542   : > { %4637 = vst.msk [vmem:[%s6504_s20 + $0x30] sm:$0xff] %vm338_vm0, %v4629_v1 }
 0x543   : > { %v4630_v33 = vadd.f32 %v4622_v2, %v4606_v22 }
 0x545   : > { %4638 = vst.msk [vmem:[%s6504_s20 + $0x38] sm:$0xff] %vm338_vm0, %v4630_v33 }
 0x546   : > { %5539 = shalt.err (!%p5536_p7)
}
 0x547   : > { %s5540_s10 = scalar_lea.hbm %s6546_s25, 1024  ;;  %s5544_s19 = scalar_lea.hbm %s6602_s7, 2048 }
 0x548   : > { %p5541_p8 = scmp.ne.s32.totalorder %s6546_s25, %s5540_s10  ;;  %p5545_p1 = scmp.lt.u32.totalorder %s6546_s25, %s6602_s7 }
 0x549   : > { %p5546_p0 = scmp.lt.u32.totalorder %s5544_s19, %s5540_s10  ;;  %p5548_p6 = scmp.lt.u32.totalorder %s5540_s10, %s6546_s25 }
 0x54a   : > { %p5542_p11 = pnand %p5541_p8, %p6640_p9 }
 0x54b   : > { %p5547_p5 = por %p5546_p0, %p5545_p1 }
 0x54c   : > { %p5543_p13 = pneg %p5542_p11 }
 0x54d   : > { %p5549_p10 = por %p5548_p6, %p5547_p5 }
 0x54f   : > { %p5550_p12 = pnand %p5549_p10, %p5543_p13 }
 0x551   : > { %5553 = shalt.err (!%p5550_p12)
}
 0x552   : > { %s5601_s21 = smov 128   ;;  %s5602_s23 = smov 8  }
 0x553   : > { %5341 = dma.vmem_to_hbm [thread:$0]  (%p6640_p9), %s6548_s22, 1024, %s6546_s25, %s6554_s6, %s5601_s21, %s5601_s21, %s5602_s23  }
 0x554 PF: > { %p5353_p2 = scmp.ge.s32.totalorder %s5592_s29, 2  ;;  %s4668_s24 = sand.u32 1, %s5580_s26  }
 0x555   : > { %p6641_p3 = scmp.ne.s32.totalorder %s6617_s13, 0  ;;  %s4669_s30 = scalar_lea.sflag [#allocation5], %s4668_s24 }
 0x557   : > { %p5348_p4 = pnand %p5353_p2, %p6641_p3 }
 0x559   : > { %5575 = dma.done.wait (!%p5348_p4), %s4669_s30, 1024  }
 0x55a   : > { %5577 = vsyncadd (!%p5348_p4), %s4669_s30, 4294966272  ;;  %p19_p7 = scmp.ge.s32.totalorder %s5671_s8, 4   ;;  %s6642_s26 = smov %s5584_s27 }
 0x55b   : > { %s6643_s27 = smov %s5588_s28  ;;  %s6644_s28 = smov %s5682_s11 }
 0x55c   : > { %s6645_s29 = smov %s5671_s8  ;;  %21 = sbr.rel (!%p19_p7) target bundleno = 6 (0x6), region = 91 }
 0x563   :  { %4674 = vsyncpa [#allocation4], 1 }
 0x564   :  { %4676 = vsyncpa [#allocation4 + $0x1], 1 }
 0x565   :  { %4677 = vsyncpa [#allocation5], 1 }
 0x566   :  { %4679 = vsyncpa [#allocation5 + $0x1], 1 }

</bundles_post_ra>
